<compile_context>
chip_gen: v7x
topology: tpu7x:2x2x1
jax: 0.10.0
libtpu: 0.0.40
codegen_flags: <defaults>
</compile_context>

<pallas_src>
import numpy as np
import jax
import jax.numpy as jnp
from jax import lax
from jax.experimental import pallas as pl
from jax.experimental.pallas import tpu as pltpu


def _dihedral_kernel(k_ref, x_ref, o_ref):
    """Apply dihedral(x, k) on the full (C, H, W) float32 block (H == W)."""
    k = k_ref[0]
    flip_w = (k == 1) | (k == 3) | (k == 4) | (k == 7)   # x.flip(-1)
    flip_h = (k == 2) | (k == 4) | (k == 5) | (k == 7)   # x.flip(-2)
    do_t = (k == 3) | (k == 5) | (k == 6) | (k == 7)     # x.transpose(-1, -2)

    C, H, W = x_ref.shape   # square image: H == W

    def _anti_diag():
        # Anti-diagonal permutation matrix J: x @ J flips lanes, J @ x flips
        # sublanes.  Exact for permutations; only built when a flip is taken.
        rr = lax.broadcasted_iota(jnp.int32, (H, H), 0)
        cc = lax.broadcasted_iota(jnp.int32, (H, H), 1)
        return (rr + cc == H - 1).astype(jnp.float32)

    # Identity baseline; the gated transforms below update o_ref in place,
    # in the same order as the PyTorch reference (flip(-1), flip(-2), T).
    o_ref[...] = x_ref[...]

    @pl.when(flip_w)
    def _():
        J = _anti_diag()
        for c in range(C):
            o_ref[c] = jnp.dot(o_ref[c], J, preferred_element_type=jnp.float32)

    @pl.when(flip_h)
    def _():
        J = _anti_diag()
        for c in range(C):
            o_ref[c] = jnp.dot(J, o_ref[c], preferred_element_type=jnp.float32)

    @pl.when(do_t)
    def _():
        for c in range(C):
            o_ref[c] = o_ref[c].T


def dihedral_pallas(x_chw_f32, k):
    """dihedral(x, k) on a CHW float32 array (values 0..255), k: (1,) int32."""
    C, H, W = x_chw_f32.shape
    assert H == W, "dihedral transpose assumes square images"
    return pl.pallas_call(
        _dihedral_kernel,
        out_shape=jax.ShapeDtypeStruct((C, H, W), jnp.float32),
        in_specs=[
            pl.BlockSpec(memory_space=pltpu.MemorySpace.SMEM),   # k scalar
            pl.BlockSpec(memory_space=pltpu.MemorySpace.VMEM),   # image
        ],
        out_specs=pl.BlockSpec(memory_space=pltpu.MemorySpace.VMEM),
    )(k, x_chw_f32)


def rotate_dihedral(img_hwc_uint8, key):
    """Full Rotate_dihedral.forward: HWC uint8 image -> (HWC uint8, k)."""
    # ToTensor layout change only (HWC -> CHW); scale round trip dropped.
    x = jnp.transpose(img_hwc_uint8, (2, 0, 1)).astype(jnp.float32)
    # k = np.random.randint(0, 7) -> k in {0..6}; stays on device (no sync).
    k = jax.random.randint(key, (1,), 0, 7, dtype=jnp.int32)
    out_chw = dihedral_pallas(x, k)
    # PIL glue: uint8 cast + CHW -> HWC.
    img_out = jnp.transpose(out_chw, (1, 2, 0)).astype(jnp.uint8)
    return img_out, k


def _ref_dihedral_hwc(img_hwc, k):
    """Numpy reference, expressed directly on the HWC uint8 image."""
    x = np.asarray(img_hwc)
    if k in (1, 3, 4, 7):
        x = x[:, ::-1, :]            # flip(-1) on CHW == flip W
    if k in (2, 4, 5, 7):
        x = x[::-1, :, :]            # flip(-2) on CHW == flip H
    if k in (3, 5, 6, 7):
        x = np.swapaxes(x, 0, 1)     # transpose(-1, -2) on CHW
    return x


if __name__ == "__main__":
    key = jax.random.PRNGKey(0)
    k_img, k_pick = jax.random.split(key)

    H = W = 128
    C = 3
    img = jax.random.randint(
        k_img, (H, W, C), 0, 256, dtype=jnp.int32
    ).astype(jnp.uint8)

    # Full forward once (random k drawn on device, no host sync in the op).
    img_out, k_dev = rotate_dihedral(img, k_pick)
    jax.block_until_ready(img_out)

    # Test-only host readback of k to build the numpy reference.
    k_val = int(jax.device_get(k_dev)[0])
    ref = _ref_dihedral_hwc(img, k_val)
    assert img_out.shape == ref.shape and img_out.dtype == jnp.uint8
    assert np.array_equal(np.asarray(img_out), ref), "mismatch vs reference"

    # Exhaustive check of every dihedral element (same compiled kernel,
    # k is a runtime input).
    x_chw = jnp.transpose(img, (2, 0, 1)).astype(jnp.float32)
    for kk in range(7):
        out = dihedral_pallas(x_chw, jnp.array([kk], dtype=jnp.int32))
        got = np.transpose(np.asarray(out), (1, 2, 0)).astype(np.uint8)
        exp = _ref_dihedral_hwc(img, kk)
        assert np.array_equal(got, exp), f"mismatch for k={kk}"

    print("KERNEL_OK")
</pallas_src>

<mosaic_0001>
module attributes {stable_mosaic.version = 11 : i64} {
  func.func @_dihedral_kernel(%arg0: memref<1xi32, #tpu.memory_space<smem>>, %arg1: memref<3x128x128xf32, #tpu.memory_space<vmem>>, %arg2: memref<3x128x128xf32, #tpu.memory_space<vmem>>) attributes {dimension_semantics = [], scalar_prefetch = 0 : i64, scratch_operands = 0 : i64, tpu.core_type = #tpu.core_type<tc>} {
    %c0 = arith.constant 0 : index
    %0 = memref.load %arg0[%c0] : memref<1xi32, #tpu.memory_space<smem>>
    %c1_i32 = arith.constant 1 : i32
    %1 = arith.cmpi eq, %0, %c1_i32 : i32
    %c3_i32 = arith.constant 3 : i32
    %2 = arith.cmpi eq, %0, %c3_i32 : i32
    %3 = arith.ori %1, %2 : i1
    %c4_i32 = arith.constant 4 : i32
    %4 = arith.cmpi eq, %0, %c4_i32 : i32
    %5 = arith.ori %3, %4 : i1
    %c7_i32 = arith.constant 7 : i32
    %6 = arith.cmpi eq, %0, %c7_i32 : i32
    %7 = arith.ori %5, %6 : i1
    %c2_i32 = arith.constant 2 : i32
    %8 = arith.cmpi eq, %0, %c2_i32 : i32
    %c4_i32_0 = arith.constant 4 : i32
    %9 = arith.cmpi eq, %0, %c4_i32_0 : i32
    %10 = arith.ori %8, %9 : i1
    %c5_i32 = arith.constant 5 : i32
    %11 = arith.cmpi eq, %0, %c5_i32 : i32
    %12 = arith.ori %10, %11 : i1
    %c7_i32_1 = arith.constant 7 : i32
    %13 = arith.cmpi eq, %0, %c7_i32_1 : i32
    %14 = arith.ori %12, %13 : i1
    %c3_i32_2 = arith.constant 3 : i32
    %15 = arith.cmpi eq, %0, %c3_i32_2 : i32
    %c5_i32_3 = arith.constant 5 : i32
    %16 = arith.cmpi eq, %0, %c5_i32_3 : i32
    %17 = arith.ori %15, %16 : i1
    %c6_i32 = arith.constant 6 : i32
    %18 = arith.cmpi eq, %0, %c6_i32 : i32
    %19 = arith.ori %17, %18 : i1
    %c7_i32_4 = arith.constant 7 : i32
    %20 = arith.cmpi eq, %0, %c7_i32_4 : i32
    %21 = arith.ori %19, %20 : i1
    %c0_5 = arith.constant 0 : index
    %c0_6 = arith.constant 0 : index
    %c0_7 = arith.constant 0 : index
    %22 = vector.load %arg1[%c0_5, %c0_6, %c0_7] : memref<3x128x128xf32, #tpu.memory_space<vmem>>, vector<3x128x128xf32>
    %c0_8 = arith.constant 0 : index
    %c0_9 = arith.constant 0 : index
    %c0_10 = arith.constant 0 : index
    %23 = vector.load %arg2[%c0_8, %c0_9, %c0_10] : memref<3x128x128xf32, #tpu.memory_space<vmem>>, vector<3x128x128xf32>
    tpu.vector_store %arg2[%c0_8, %c0_9, %c0_10], %22 {strides = array<i32>} : memref<3x128x128xf32, #tpu.memory_space<vmem>>, vector<3x128x128xf32>,
    %24 = arith.extui %7 : i1 to i32
    %c0_i32 = arith.constant 0 : i32
    %25 = arith.cmpi ne, %24, %c0_i32 : i32
    scf.if %25 {
      %30 = tpu.iota {dimensions = array<i32: 0>} : vector<128x128xi32>
      %31 = tpu.iota {dimensions = array<i32: 1>} : vector<128x128xi32>
      %32 = arith.addi %30, %31 : vector<128x128xi32>
      %c127_i32 = arith.constant 127 : i32
      %33 = vector.broadcast %c127_i32 : i32 to vector<128x128xi32>
      %34 = arith.cmpi eq, %32, %33 : vector<128x128xi32>
      %35 = arith.extui %34 : vector<128x128xi1> to vector<128x128xi32>
      %36 = arith.sitofp %35 : vector<128x128xi32> to vector<128x128xf32>
      %c0_13 = arith.constant 0 : index
      %c0_14 = arith.constant 0 : index
      %c0_15 = arith.constant 0 : index
      %37 = vector.load %arg2[%c0_13, %c0_14, %c0_15] : memref<3x128x128xf32, #tpu.memory_space<vmem>>, vector<1x128x128xf32>
      %38 = vector.shape_cast %37 : vector<1x128x128xf32> to vector<128x128xf32>
      %cst = arith.constant dense<0.000000e+00> : vector<128x128xf32>
      %39 = tpu.matmul %38, %36, %cst {dimension_numbers = #tpu.dot_dimension_numbers<[1], [0], [0], [1], [0, 0, 1, 1], [], []>} : vector<128x128xf32>, vector<128x128xf32>, vector<128x128xf32> -> vector<128x128xf32>
      %c0_16 = arith.constant 0 : index
      %c0_17 = arith.constant 0 : index
      %c0_18 = arith.constant 0 : index
      %40 = vector.load %arg2[%c0_16, %c0_17, %c0_18] : memref<3x128x128xf32, #tpu.memory_space<vmem>>, vector<1x128x128xf32>
      %41 = vector.shape_cast %40 : vector<1x128x128xf32> to vector<128x128xf32>
      %42 = vector.shape_cast %39 : vector<128x128xf32> to vector<1x128x128xf32>
      tpu.vector_store %arg2[%c0_16, %c0_17, %c0_18], %42 {strides = array<i32>} : memref<3x128x128xf32, #tpu.memory_space<vmem>>, vector<1x128x128xf32>,
      %c1 = arith.constant 1 : index
      %c0_19 = arith.constant 0 : index
      %c0_20 = arith.constant 0 : index
      %43 = vector.load %arg2[%c1, %c0_19, %c0_20] : memref<3x128x128xf32, #tpu.memory_space<vmem>>, vector<1x128x128xf32>
      %44 = vector.shape_cast %43 : vector<1x128x128xf32> to vector<128x128xf32>
      %cst_21 = arith.constant dense<0.000000e+00> : vector<128x128xf32>
      %45 = tpu.matmul %44, %36, %cst_21 {dimension_numbers = #tpu.dot_dimension_numbers<[1], [0], [0], [1], [0, 0, 1, 1], [], []>} : vector<128x128xf32>, vector<128x128xf32>, vector<128x128xf32> -> vector<128x128xf32>
      %c1_22 = arith.constant 1 : index
      %c0_23 = arith.constant 0 : index
      %c0_24 = arith.constant 0 : index
      %46 = vector.load %arg2[%c1_22, %c0_23, %c0_24] : memref<3x128x128xf32, #tpu.memory_space<vmem>>, vector<1x128x128xf32>
      %47 = vector.shape_cast %46 : vector<1x128x128xf32> to vector<128x128xf32>
      %48 = vector.shape_cast %45 : vector<128x128xf32> to vector<1x128x128xf32>
      tpu.vector_store %arg2[%c1_22, %c0_23, %c0_24], %48 {strides = array<i32>} : memref<3x128x128xf32, #tpu.memory_space<vmem>>, vector<1x128x128xf32>,
      %c2 = arith.constant 2 : index
      %c0_25 = arith.constant 0 : index
      %c0_26 = arith.constant 0 : index
      %49 = vector.load %arg2[%c2, %c0_25, %c0_26] : memref<3x128x128xf32, #tpu.memory_space<vmem>>, vector<1x128x128xf32>
      %50 = vector.shape_cast %49 : vector<1x128x128xf32> to vector<128x128xf32>
      %cst_27 = arith.constant dense<0.000000e+00> : vector<128x128xf32>
      %51 = tpu.matmul %50, %36, %cst_27 {dimension_numbers = #tpu.dot_dimension_numbers<[1], [0], [0], [1], [0, 0, 1, 1], [], []>} : vector<128x128xf32>, vector<128x128xf32>, vector<128x128xf32> -> vector<128x128xf32>
      %c2_28 = arith.constant 2 : index
      %c0_29 = arith.constant 0 : index
      %c0_30 = arith.constant 0 : index
      %52 = vector.load %arg2[%c2_28, %c0_29, %c0_30] : memref<3x128x128xf32, #tpu.memory_space<vmem>>, vector<1x128x128xf32>
      %53 = vector.shape_cast %52 : vector<1x128x128xf32> to vector<128x128xf32>
      %54 = vector.shape_cast %51 : vector<128x128xf32> to vector<1x128x128xf32>
      tpu.vector_store %arg2[%c2_28, %c0_29, %c0_30], %54 {strides = array<i32>} : memref<3x128x128xf32, #tpu.memory_space<vmem>>, vector<1x128x128xf32>,
    } else {
    }
    %26 = arith.extui %14 : i1 to i32
    %c0_i32_11 = arith.constant 0 : i32
    %27 = arith.cmpi ne, %26, %c0_i32_11 : i32
    scf.if %27 {
      %30 = tpu.iota {dimensions = array<i32: 0>} : vector<128x128xi32>
      %31 = tpu.iota {dimensions = array<i32: 1>} : vector<128x128xi32>
      %32 = arith.addi %30, %31 : vector<128x128xi32>
      %c127_i32 = arith.constant 127 : i32
      %33 = vector.broadcast %c127_i32 : i32 to vector<128x128xi32>
      %34 = arith.cmpi eq, %32, %33 : vector<128x128xi32>
      %35 = arith.extui %34 : vector<128x128xi1> to vector<128x128xi32>
      %36 = arith.sitofp %35 : vector<128x128xi32> to vector<128x128xf32>
      %c0_13 = arith.constant 0 : index
      %c0_14 = arith.constant 0 : index
      %c0_15 = arith.constant 0 : index
      %37 = vector.load %arg2[%c0_13, %c0_14, %c0_15] : memref<3x128x128xf32, #tpu.memory_space<vmem>>, vector<1x128x128xf32>
      %38 = vector.shape_cast %37 : vector<1x128x128xf32> to vector<128x128xf32>
      %cst = arith.constant dense<0.000000e+00> : vector<128x128xf32>
      %39 = tpu.matmul %36, %38, %cst {dimension_numbers = #tpu.dot_dimension_numbers<[1], [0], [0], [1], [0, 0, 1, 1], [], []>} : vector<128x128xf32>, vector<128x128xf32>, vector<128x128xf32> -> vector<128x128xf32>
      %c0_16 = arith.constant 0 : index
      %c0_17 = arith.constant 0 : index
      %c0_18 = arith.constant 0 : index
      %40 = vector.load %arg2[%c0_16, %c0_17, %c0_18] : memref<3x128x128xf32, #tpu.memory_space<vmem>>, vector<1x128x128xf32>
      %41 = vector.shape_cast %40 : vector<1x128x128xf32> to vector<128x128xf32>
      %42 = vector.shape_cast %39 : vector<128x128xf32> to vector<1x128x128xf32>
      tpu.vector_store %arg2[%c0_16, %c0_17, %c0_18], %42 {strides = array<i32>} : memref<3x128x128xf32, #tpu.memory_space<vmem>>, vector<1x128x128xf32>,
      %c1 = arith.constant 1 : index
      %c0_19 = arith.constant 0 : index
      %c0_20 = arith.constant 0 : index
      %43 = vector.load %arg2[%c1, %c0_19, %c0_20] : memref<3x128x128xf32, #tpu.memory_space<vmem>>, vector<1x128x128xf32>
      %44 = vector.shape_cast %43 : vector<1x128x128xf32> to vector<128x128xf32>
      %cst_21 = arith.constant dense<0.000000e+00> : vector<128x128xf32>
      %45 = tpu.matmul %36, %44, %cst_21 {dimension_numbers = #tpu.dot_dimension_numbers<[1], [0], [0], [1], [0, 0, 1, 1], [], []>} : vector<128x128xf32>, vector<128x128xf32>, vector<128x128xf32> -> vector<128x128xf32>
      %c1_22 = arith.constant 1 : index
      %c0_23 = arith.constant 0 : index
      %c0_24 = arith.constant 0 : index
      %46 = vector.load %arg2[%c1_22, %c0_23, %c0_24] : memref<3x128x128xf32, #tpu.memory_space<vmem>>, vector<1x128x128xf32>
      %47 = vector.shape_cast %46 : vector<1x128x128xf32> to vector<128x128xf32>
      %48 = vector.shape_cast %45 : vector<128x128xf32> to vector<1x128x128xf32>
      tpu.vector_store %arg2[%c1_22, %c0_23, %c0_24], %48 {strides = array<i32>} : memref<3x128x128xf32, #tpu.memory_space<vmem>>, vector<1x128x128xf32>,
      %c2 = arith.constant 2 : index
      %c0_25 = arith.constant 0 : index
      %c0_26 = arith.constant 0 : index
      %49 = vector.load %arg2[%c2, %c0_25, %c0_26] : memref<3x128x128xf32, #tpu.memory_space<vmem>>, vector<1x128x128xf32>
      %50 = vector.shape_cast %49 : vector<1x128x128xf32> to vector<128x128xf32>
      %cst_27 = arith.constant dense<0.000000e+00> : vector<128x128xf32>
      %51 = tpu.matmul %36, %50, %cst_27 {dimension_numbers = #tpu.dot_dimension_numbers<[1], [0], [0], [1], [0, 0, 1, 1], [], []>} : vector<128x128xf32>, vector<128x128xf32>, vector<128x128xf32> -> vector<128x128xf32>
      %c2_28 = arith.constant 2 : index
      %c0_29 = arith.constant 0 : index
      %c0_30 = arith.constant 0 : index
      %52 = vector.load %arg2[%c2_28, %c0_29, %c0_30] : memref<3x128x128xf32, #tpu.memory_space<vmem>>, vector<1x128x128xf32>
      %53 = vector.shape_cast %52 : vector<1x128x128xf32> to vector<128x128xf32>
      %54 = vector.shape_cast %51 : vector<128x128xf32> to vector<1x128x128xf32>
      tpu.vector_store %arg2[%c2_28, %c0_29, %c0_30], %54 {strides = array<i32>} : memref<3x128x128xf32, #tpu.memory_space<vmem>>, vector<1x128x128xf32>,
    } else {
    }
    %28 = arith.extui %21 : i1 to i32
    %c0_i32_12 = arith.constant 0 : i32
    %29 = arith.cmpi ne, %28, %c0_i32_12 : i32
    scf.if %29 {
      %c0_13 = arith.constant 0 : index
      %c0_14 = arith.constant 0 : index
      %c0_15 = arith.constant 0 : index
      %30 = vector.load %arg2[%c0_13, %c0_14, %c0_15] : memref<3x128x128xf32, #tpu.memory_space<vmem>>, vector<1x128x128xf32>
      %31 = vector.shape_cast %30 : vector<1x128x128xf32> to vector<128x128xf32>
      %32 = tpu.transpose %31, [1, 0] : vector<128x128xf32> -> vector<128x128xf32>
      %c0_16 = arith.constant 0 : index
      %c0_17 = arith.constant 0 : index
      %c0_18 = arith.constant 0 : index
      %33 = vector.load %arg2[%c0_16, %c0_17, %c0_18] : memref<3x128x128xf32, #tpu.memory_space<vmem>>, vector<1x128x128xf32>
      %34 = vector.shape_cast %33 : vector<1x128x128xf32> to vector<128x128xf32>
      %35 = vector.shape_cast %32 : vector<128x128xf32> to vector<1x128x128xf32>
      tpu.vector_store %arg2[%c0_16, %c0_17, %c0_18], %35 {strides = array<i32>} : memref<3x128x128xf32, #tpu.memory_space<vmem>>, vector<1x128x128xf32>,
      %c1 = arith.constant 1 : index
      %c0_19 = arith.constant 0 : index
      %c0_20 = arith.constant 0 : index
      %36 = vector.load %arg2[%c1, %c0_19, %c0_20] : memref<3x128x128xf32, #tpu.memory_space<vmem>>, vector<1x128x128xf32>
      %37 = vector.shape_cast %36 : vector<1x128x128xf32> to vector<128x128xf32>
      %38 = tpu.transpose %37, [1, 0] : vector<128x128xf32> -> vector<128x128xf32>
      %c1_21 = arith.constant 1 : index
      %c0_22 = arith.constant 0 : index
      %c0_23 = arith.constant 0 : index
      %39 = vector.load %arg2[%c1_21, %c0_22, %c0_23] : memref<3x128x128xf32, #tpu.memory_space<vmem>>, vector<1x128x128xf32>
      %40 = vector.shape_cast %39 : vector<1x128x128xf32> to vector<128x128xf32>
      %41 = vector.shape_cast %38 : vector<128x128xf32> to vector<1x128x128xf32>
      tpu.vector_store %arg2[%c1_21, %c0_22, %c0_23], %41 {strides = array<i32>} : memref<3x128x128xf32, #tpu.memory_space<vmem>>, vector<1x128x128xf32>,
      %c2 = arith.constant 2 : index
      %c0_24 = arith.constant 0 : index
      %c0_25 = arith.constant 0 : index
      %42 = vector.load %arg2[%c2, %c0_24, %c0_25] : memref<3x128x128xf32, #tpu.memory_space<vmem>>, vector<1x128x128xf32>
      %43 = vector.shape_cast %42 : vector<1x128x128xf32> to vector<128x128xf32>
      %44 = tpu.transpose %43, [1, 0] : vector<128x128xf32> -> vector<128x128xf32>
      %c2_26 = arith.constant 2 : index
      %c0_27 = arith.constant 0 : index
      %c0_28 = arith.constant 0 : index
      %45 = vector.load %arg2[%c2_26, %c0_27, %c0_28] : memref<3x128x128xf32, #tpu.memory_space<vmem>>, vector<1x128x128xf32>
      %46 = vector.shape_cast %45 : vector<1x128x128xf32> to vector<128x128xf32>
      %47 = vector.shape_cast %44 : vector<128x128xf32> to vector<1x128x128xf32>
      tpu.vector_store %arg2[%c2_26, %c0_27, %c0_28], %47 {strides = array<i32>} : memref<3x128x128xf32, #tpu.memory_space<vmem>>, vector<1x128x128xf32>,
    } else {
    }
    return
  }
}

</mosaic_0001>

<bundles_post_ra>
// kernel: tpu_custom_call.1
= control target key start
LH: loop header
LB: loop body
LE: loop exit
PB: predicated region body
PF: predicated region fallthrough
CT: control target
= control target key end

     0   :  { %8 = vsyncpa [#allocation4], 0  ;;  %s3068_s0 = inlined_call_operand.<no memory space> [shape: s32[1], index: 0, kind: input, shape index: {}]   ;;  %s3069_s1 = inlined_call_operand.hbm [shape: f32[3,128,128], index: 1, kind: input, shape index: {}]   ;;  %s3070_s2 = inlined_call_operand.hbm [shape: f32[3,128,128], index: 2, kind: output, shape index: {}]  }
   0x1   :  { %9 = vsyncpa [#allocation5], 0  ;;  %s2526_s9 = smov [#allocation3]   ;;  %s2478_s13 = scalar_lea.hbm %s3069_s1, 6144 }
   0x2   :  { %s17_s10 = sshll.u32 %s2526_s9, 4  ;;  %p2479_p0 = scmp.ne.s32.totalorder %s3069_s1, %s2478_s13  ;;  %s18_s10 = int_to_ptr.vmem [resolvable:$true] %s17_s10 }
   0x3   :  { %p2482_p1 = scmp.lt.u32.totalorder %s2478_s13, %s3069_s1 }
   0x5   :  { %p2484_p2 = pnand %p2482_p1, %p2479_p0 }
   0x7   :  { %2487 = shalt.err (!%p2484_p2)
}
   0x8   :  { %s2488_s18 = scalar_lea.vmem %s18_s10, 6144  ;;  %p2493_p4 = scmp.lt.s32.totalorder %s18_s10, %s18_s10 }
   0x9   :  { %p2489_p3 = scmp.ne.s32.totalorder %s18_s10, %s2488_s18  ;;  %p2494_p5 = scmp.lt.s32.totalorder %s2488_s18, %s2488_s18 }
   0xb   :  { %p2495_p6 = por %p2494_p5, %p2493_p4 }
   0xd   :  { %p2496_p7 = pnand %p2495_p6, %p2489_p3 }
   0xf   :  { %2499 = shalt.err (!%p2496_p7)
}
  0x10   :  { %s2527_s19 = smov 128   ;;  %s2528_s20 = smov 8  }
  0x11   :  { %23 = dma.hbm_to_vmem [thread:$0]  %s3069_s1, 6144, %s18_s10, [#allocation4], %s2527_s19, %s2527_s19, %s2528_s20  }
  0x12   :  { %2522 = dma.done.wait [#allocation4], 6144  }
  0x13   :  { %2523 = vsyncadd [#allocation4], 4294961152  ;;  %p28_p8 = scmp.eq.s32.totalorder %s3068_s0, 1  ;;  %p29_p9 = scmp.eq.s32.totalorder %s3068_s0, 3  ;;  %v44_v0 = vld [vmem:[#allocation3] sm:$0xff]  ;;  %v45_v1 = vld [vmem:[#allocation3 + $0x8] sm:$0xff] }
  0x14   :  { %p31_p10 = scmp.eq.s32.totalorder %s3068_s0, 4  ;;  %p33_p11 = scmp.eq.s32.totalorder %s3068_s0, 7  ;;  %v46_v2 = vld [vmem:[#allocation3 + $0x10] sm:$0xff]  ;;  %92 = vst [vmem:[#allocation6] sm:$0xff] %v44_v0  ;;  %93 = vst [vmem:[#allocation6 + $0x8] sm:$0xff] %v45_v1  ;;  %v47_v3 = vld [vmem:[#allocation3 + $0x18] sm:$0xff] }
  0x15   :  { %p30_p12 = por %p29_p9, %p28_p8  ;;  %p35_p13 = scmp.eq.s32.totalorder %s3068_s0, 2  ;;  %94 = vst [vmem:[#allocation6 + $0x10] sm:$0xff] %v46_v2  ;;  %v48_v4 = vld [vmem:[#allocation3 + $0x20] sm:$0xff]  ;;  %v49_v5 = vld [vmem:[#allocation3 + $0x28] sm:$0xff]  ;;  %95 = vst [vmem:[#allocation6 + $0x18] sm:$0xff] %v47_v3 }
  0x16   :  { %p37_p0 = scmp.eq.s32.totalorder %s3068_s0, 5  ;;  %p41_p1 = scmp.eq.s32.totalorder %s3068_s0, 6  ;;  %96 = vst [vmem:[#allocation6 + $0x20] sm:$0xff] %v48_v4  ;;  %97 = vst [vmem:[#allocation6 + $0x28] sm:$0xff] %v49_v5  ;;  %v50_v6 = vld [vmem:[#allocation3 + $0x30] sm:$0xff]  ;;  %v51_v7 = vld [vmem:[#allocation3 + $0x38] sm:$0xff] }
  0x17   :  { %p32_p2 = por %p31_p10, %p30_p12  ;;  %p36_p3 = por %p35_p13, %p31_p10  ;;  %v52_v8 = vld [vmem:[#allocation3 + $0x40] sm:$0xff]  ;;  %98 = vst [vmem:[#allocation6 + $0x30] sm:$0xff] %v50_v6  ;;  %99 = vst [vmem:[#allocation6 + $0x38] sm:$0xff] %v51_v7  ;;  %v53_v9 = vld [vmem:[#allocation3 + $0x48] sm:$0xff] }
  0x18   :  { %p40_p4 = por %p37_p0, %p29_p9  ;;  %100 = vst [vmem:[#allocation6 + $0x40] sm:$0xff] %v52_v8  ;;  %v54_v10 = vld [vmem:[#allocation3 + $0x50] sm:$0xff]  ;;  %v55_v11 = vld [vmem:[#allocation3 + $0x58] sm:$0xff]  ;;  %101 = vst [vmem:[#allocation6 + $0x48] sm:$0xff] %v53_v9 }
  0x19   :  { %p2587_p5 = por %p33_p11, %p32_p2  ;;  %p38_p6 = por %p37_p0, %p36_p3  ;;  %102 = vst [vmem:[#allocation6 + $0x50] sm:$0xff] %v54_v10  ;;  %103 = vst [vmem:[#allocation6 + $0x58] sm:$0xff] %v55_v11  ;;  %v56_v12 = vld [vmem:[#allocation3 + $0x60] sm:$0xff]  ;;  %v57_v13 = vld [vmem:[#allocation3 + $0x68] sm:$0xff] }
  0x1a   :  { %p42_p7 = por %p41_p1, %p40_p4  ;;  %v58_v14 = vld [vmem:[#allocation3 + $0x70] sm:$0xff]  ;;  %104 = vst [vmem:[#allocation6 + $0x60] sm:$0xff] %v56_v12  ;;  %105 = vst [vmem:[#allocation6 + $0x68] sm:$0xff] %v57_v13  ;;  %v59_v15 = vld [vmem:[#allocation3 + $0x78] sm:$0xff]  ;;  %v143_v48 = vlaneseq (%p2587_p5)  ;;  %v2529_v5 = vmov (%p2587_p5), 1.0|1.0  }
  0x1b   :  { %p2595_p8 = por %p38_p6, %p33_p11  ;;  %106 = vst [vmem:[#allocation6 + $0x70] sm:$0xff] %v58_v14  ;;  %v60_v16 = vld [vmem:[#allocation3 + $0x80] sm:$0xff]  ;;  %v61_v17 = vld [vmem:[#allocation3 + $0x88] sm:$0xff]  ;;  %107 = vst [vmem:[#allocation6 + $0x78] sm:$0xff] %v59_v15 }
  0x1c   :  { %p2603_p9 = por %p42_p7, %p33_p11  ;;  %108 = vst [vmem:[#allocation6 + $0x80] sm:$0xff] %v60_v16  ;;  %109 = vst [vmem:[#allocation6 + $0x88] sm:$0xff] %v61_v17  ;;  %v62_v18 = vld [vmem:[#allocation3 + $0x90] sm:$0xff]  ;;  %v63_v19 = vld [vmem:[#allocation3 + $0x98] sm:$0xff]  ;;  %v144_v51 = vshrl.u32 (%p2587_p5), %v143_v48, 7  ;;  %v2609_v52 = vand.u32 (%p2587_p5), 127, %v143_v48 }
  0x1d   :  { %v64_v20 = vld [vmem:[#allocation3 + $0xa0] sm:$0xff]  ;;  %110 = vst [vmem:[#allocation6 + $0x90] sm:$0xff] %v62_v18  ;;  %111 = vst [vmem:[#allocation6 + $0x98] sm:$0xff] %v63_v19  ;;  %v65_v21 = vld [vmem:[#allocation3 + $0xa8] sm:$0xff] }
  0x1e   :  { %112 = vst [vmem:[#allocation6 + $0xa0] sm:$0xff] %v64_v20  ;;  %v66_v22 = vld [vmem:[#allocation3 + $0xb0] sm:$0xff]  ;;  %v67_v23 = vld [vmem:[#allocation3 + $0xb8] sm:$0xff]  ;;  %113 = vst [vmem:[#allocation6 + $0xa8] sm:$0xff] %v65_v21  ;;  %v145_v53 = vadd.s32 (%p2587_p5), 8, %v144_v51  ;;  %v162_v54 = vadd.s32 (%p2587_p5), %v2609_v52, %v144_v51  ;;  %v146_v55 = vadd.s32 (%p2587_p5), 16, %v144_v51 }
  0x1f   :  { %114 = vst [vmem:[#allocation6 + $0xb0] sm:$0xff] %v66_v22  ;;  %115 = vst [vmem:[#allocation6 + $0xb8] sm:$0xff] %v67_v23  ;;  %v68_v24 = vld [vmem:[#allocation3 + $0xc0] sm:$0xff]  ;;  %v69_v25 = vld [vmem:[#allocation3 + $0xc8] sm:$0xff]  ;;  %v147_v56 = vadd.s32 (%p2587_p5), 24, %v144_v51  ;;  %v148_v57 = vadd.s32 (%p2587_p5), 32, %v144_v51 }
  0x20   :  { %v70_v26 = vld [vmem:[#allocation3 + $0xd0] sm:$0xff]  ;;  %116 = vst [vmem:[#allocation6 + $0xc0] sm:$0xff] %v68_v24  ;;  %117 = vst [vmem:[#allocation6 + $0xc8] sm:$0xff] %v69_v25  ;;  %v71_v27 = vld [vmem:[#allocation3 + $0xd8] sm:$0xff]  ;;  %v149_v58 = vadd.s32 (%p2587_p5), 40, %v144_v51  ;;  %v150_v59 = vadd.s32 (%p2587_p5), 48, %v144_v51  ;;  %v163_v61 = vadd.s32 (%p2587_p5), %v2609_v52, %v145_v53  ;;  %v164_v62 = vadd.s32 (%p2587_p5), %v2609_v52, %v146_v55 }
  0x21   :  { %118 = vst [vmem:[#allocation6 + $0xd0] sm:$0xff] %v70_v26  ;;  %v72_v28 = vld [vmem:[#allocation3 + $0xe0] sm:$0xff]  ;;  %v73_v29 = vld [vmem:[#allocation3 + $0xe8] sm:$0xff]  ;;  %119 = vst [vmem:[#allocation6 + $0xd8] sm:$0xff] %v71_v27  ;;  %v151_v60 = vadd.s32 (%p2587_p5), 56, %v144_v51  ;;  %vm178_vm0 = vcmp.eq.s32.totalorder (%p2587_p5), %v162_v54, 127  ;;  %v165_v63 = vadd.s32 (%p2587_p5), %v2609_v52, %v147_v56  ;;  %v166_v0 = vadd.s32 (%p2587_p5), %v2609_v52, %v148_v57 }
  0x22   :  { %120 = vst [vmem:[#allocation6 + $0xe0] sm:$0xff] %v72_v28  ;;  %121 = vst [vmem:[#allocation6 + $0xe8] sm:$0xff] %v73_v29  ;;  %v74_v30 = vld [vmem:[#allocation3 + $0xf0] sm:$0xff]  ;;  %v75_v31 = vld [vmem:[#allocation3 + $0xf8] sm:$0xff]  ;;  %v167_v1 = vadd.s32 (%p2587_p5), %v2609_v52, %v149_v58  ;;  %vm179_vm1 = vcmp.eq.s32.totalorder (%p2587_p5), %v163_v61, 127  ;;  %vm180_vm2 = vcmp.eq.s32.totalorder (%p2587_p5), %v164_v62, 127  ;;  %v168_v3 = vadd.s32 (%p2587_p5), %v2609_v52, %v150_v59 }
  0x23   :  { %v76_v32 = vld [vmem:[#allocation3 + $0x100] sm:$0xff]  ;;  %122 = vst [vmem:[#allocation6 + $0xf0] sm:$0xff] %v74_v30  ;;  %123 = vst [vmem:[#allocation6 + $0xf8] sm:$0xff] %v75_v31  ;;  %v77_v33 = vld [vmem:[#allocation3 + $0x108] sm:$0xff]  ;;  %vm181_vm3 = vcmp.eq.s32.totalorder (%p2587_p5), %v165_v63, 127  ;;  %v169_v4 = vadd.s32 (%p2587_p5), %v2609_v52, %v151_v60  ;;  %vm182_vm6 = vcmp.eq.s32.totalorder (%p2587_p5), %v166_v0, 127 }
  0x24   :  { %124 = vst [vmem:[#allocation6 + $0x100] sm:$0xff] %v76_v32  ;;  %v78_v34 = vld [vmem:[#allocation3 + $0x110] sm:$0xff]  ;;  %v79_v35 = vld [vmem:[#allocation3 + $0x118] sm:$0xff]  ;;  %125 = vst [vmem:[#allocation6 + $0x108] sm:$0xff] %v77_v33  ;;  %vm183_vm7 = vcmp.eq.s32.totalorder (%p2587_p5), %v167_v1, 127  ;;  %v152_v7 = vadd.s32 (%p2587_p5), 64, %v144_v51 }
  0x25   :  { %126 = vst [vmem:[#allocation6 + $0x110] sm:$0xff] %v78_v34  ;;  %127 = vst [vmem:[#allocation6 + $0x118] sm:$0xff] %v79_v35  ;;  %v80_v36 = vld [vmem:[#allocation3 + $0x120] sm:$0xff]  ;;  %v81_v37 = vld [vmem:[#allocation3 + $0x128] sm:$0xff]  ;;  %142 = sbr.rel (!%p2587_p5) target bundleno = 336 (0x150), region = 17  ;;  %v153_v8 = vadd.s32 (%p2587_p5), 72, %v144_v51 }
  0x26   :  { %v82_v38 = vld [vmem:[#allocation3 + $0x130] sm:$0xff]  ;;  %128 = vst [vmem:[#allocation6 + $0x120] sm:$0xff] %v80_v36  ;;  %129 = vst [vmem:[#allocation6 + $0x128] sm:$0xff] %v81_v37  ;;  %v83_v39 = vld [vmem:[#allocation3 + $0x138] sm:$0xff]  ;;  %vm184_vm9 = vcmp.eq.s32.totalorder (%p2587_p5), %v168_v3, 127  ;;  %vm185_vm10 = vcmp.eq.s32.totalorder (%p2587_p5), %v169_v4, 127  ;;  %v170_v10 = vadd.s32 (%p2587_p5), %v2609_v52, %v152_v7 }
  0x27   :  { %130 = vst [vmem:[#allocation6 + $0x130] sm:$0xff] %v82_v38  ;;  %v84_v40 = vld [vmem:[#allocation3 + $0x140] sm:$0xff]  ;;  %v85_v41 = vld [vmem:[#allocation3 + $0x148] sm:$0xff]  ;;  %131 = vst [vmem:[#allocation6 + $0x138] sm:$0xff] %v83_v39  ;;  %v171_v11 = vadd.s32 (%p2587_p5), %v2609_v52, %v153_v8  ;;  %v154_v12 = vadd.s32 (%p2587_p5), 80, %v144_v51  ;;  %v155_v13 = vadd.s32 (%p2587_p5), 88, %v144_v51 }
  0x28   :  { %132 = vst [vmem:[#allocation6 + $0x140] sm:$0xff] %v84_v40  ;;  %133 = vst [vmem:[#allocation6 + $0x148] sm:$0xff] %v85_v41  ;;  %v86_v42 = vld [vmem:[#allocation3 + $0x150] sm:$0xff]  ;;  %v87_v43 = vld [vmem:[#allocation3 + $0x158] sm:$0xff]  ;;  %v156_v15 = vadd.s32 (%p2587_p5), 96, %v144_v51  ;;  %v157_v16 = vadd.s32 (%p2587_p5), 104, %v144_v51 }
  0x29   :  { %v88_v44 = vld [vmem:[#allocation3 + $0x160] sm:$0xff]  ;;  %134 = vst [vmem:[#allocation6 + $0x150] sm:$0xff] %v86_v42  ;;  %135 = vst [vmem:[#allocation6 + $0x158] sm:$0xff] %v87_v43  ;;  %v89_v45 = vld [vmem:[#allocation3 + $0x168] sm:$0xff]  ;;  %vm186_vm12 = vcmp.eq.s32.totalorder (%p2587_p5), %v170_v10, 127  ;;  %vm187_vm13 = vcmp.eq.s32.totalorder (%p2587_p5), %v171_v11, 127  ;;  %v172_v17 = vadd.s32 (%p2587_p5), %v2609_v52, %v154_v12  ;;  %v173_v18 = vadd.s32 (%p2587_p5), %v2609_v52, %v155_v13 }
  0x2a   :  { %136 = vst [vmem:[#allocation6 + $0x160] sm:$0xff] %v88_v44  ;;  %v90_v46 = vld [vmem:[#allocation3 + $0x170] sm:$0xff]  ;;  %v91_v47 = vld [vmem:[#allocation3 + $0x178] sm:$0xff]  ;;  %137 = vst [vmem:[#allocation6 + $0x168] sm:$0xff] %v89_v45  ;;  %v158_v20 = vadd.s32 (%p2587_p5), 112, %v144_v51  ;;  %v159_v21 = vadd.s32 (%p2587_p5), 120, %v144_v51  ;;  %v174_v22 = vadd.s32 (%p2587_p5), %v2609_v52, %v156_v15  ;;  %v175_v23 = vadd.s32 (%p2587_p5), %v2609_v52, %v157_v16 }
  0x2b   :  { %138 = vst [vmem:[#allocation6 + $0x170] sm:$0xff] %v90_v46  ;;  %139 = vst [vmem:[#allocation6 + $0x178] sm:$0xff] %v91_v47  ;;  %v226_v49 = vld [vmem:[#allocation6] sm:$0xff] (%p2587_p5)  ;;  %vm188_vm15 = vcmp.eq.s32.totalorder (%p2587_p5), %v172_v17, 127  ;;  %v227_v29 = vld [vmem:[#allocation6 + $0x8] sm:$0xff] (%p2587_p5) }
  0x2c   :  { %v404_v50 = vld [vmem:[#allocation6 + $0x80] sm:$0xff]  ;;  %1944 = vmatprep.mubr.f32.mxu0 %v226_v49  ;;  %vm2617_vm4 = vmpackc.low %vm179_vm1, %vm178_vm0  ;;  %vm189_vm0 = vcmp.eq.s32.totalorder %v173_v18, 127  ;;  %v176_v25 = vadd.s32 %v2609_v52, %v158_v20  ;;  %v177_v26 = vadd.s32 %v2609_v52, %v159_v21  ;;  %v405_v30 = vld [vmem:[#allocation6 + $0x88] sm:$0xff] }
  0x2d   :  { %2000 = vmatprep.mubr.f32.mxu1 %v404_v50  ;;  %2249 = vmatprep.subr.msk.bf16.mxu0 %vm2617_vm4, %v2529_v5  ;;  %vm2629_vm5 = vmpackc.low %vm181_vm3, %vm180_vm2  ;;  %vm190_vm2 = vcmp.eq.s32.totalorder %v174_v22, 127  ;;  %vm191_vm3 = vcmp.eq.s32.totalorder %v175_v23, 127  ;;  %v228_v31 = vld [vmem:[#allocation6 + $0x10] sm:$0xff]  ;;  %v229_v33 = vld [vmem:[#allocation6 + $0x18] sm:$0xff] }
  0x2e   :  { %2281 = vmatprep.subr.msk.bf16.mxu1 %vm2617_vm4, %v2529_v5  ;;  %2251 = vmatpush3.bf16.msk.msra.mxu0 %vm2617_vm4, %v2529_v5  ;;  %vm2645_vm8 = vmpackc.low %vm183_vm7, %vm182_vm6  ;;  %vm192_vm7 = vcmp.eq.s32.totalorder %v176_v25, 127  ;;  %v406_v32 = vld [vmem:[#allocation6 + $0x90] sm:$0xff]  ;;  %v407_v34 = vld [vmem:[#allocation6 + $0x98] sm:$0xff] }
  0x2f   :  { %2283 = vmatpush3.bf16.msk.msra.mxu1 %vm2617_vm4, %v2529_v5  ;;  %2253 = vmatprep.subr.msk.bf16.mxu0 %vm2629_vm5, %v2529_v5  ;;  %vm2663_vm11 = vmpackc.low %vm185_vm10, %vm184_vm9  ;;  %vm193_vm9 = vcmp.eq.s32.totalorder %v177_v26, 127  ;;  %v230_v35 = vld [vmem:[#allocation6 + $0x20] sm:$0xff]  ;;  %v231_v37 = vld [vmem:[#allocation6 + $0x28] sm:$0xff] }
  0x30   :  { %2285 = vmatprep.subr.msk.bf16.mxu1 %vm2629_vm5, %v2529_v5  ;;  %vm2681_vm14 = vmpackc.low %vm187_vm13, %vm186_vm12  ;;  %v408_v36 = vld [vmem:[#allocation6 + $0xa0] sm:$0xff]  ;;  %v409_v38 = vld [vmem:[#allocation6 + $0xa8] sm:$0xff] }
  0x31   :  { %vm2699_vm1 = vmpackc.low %vm189_vm0, %vm188_vm15  ;;  %v232_v39 = vld [vmem:[#allocation6 + $0x30] sm:$0xff]  ;;  %v233_v41 = vld [vmem:[#allocation6 + $0x38] sm:$0xff] }
  0x32   :  { %2255 = vmatpush3.bf16.msk.msra.mxu0 %vm2629_vm5, %v2529_v5  ;;  %vm2717_vm6 = vmpackc.low %vm191_vm3, %vm190_vm2  ;;  %v410_v40 = vld [vmem:[#allocation6 + $0xb0] sm:$0xff]  ;;  %v411_v42 = vld [vmem:[#allocation6 + $0xb8] sm:$0xff] }
  0x33   :  { %2287 = vmatpush3.bf16.msk.msra.mxu1 %vm2629_vm5, %v2529_v5  ;;  %2257 = vmatprep.subr.msk.bf16.mxu0 %vm2645_vm8, %v2529_v5  ;;  %vm2733_vm10 = vmpackc.low %vm193_vm9, %vm192_vm7  ;;  %v234_v43 = vld [vmem:[#allocation6 + $0x40] sm:$0xff]  ;;  %v235_v45 = vld [vmem:[#allocation6 + $0x48] sm:$0xff] }
  0x34   :  { %2289 = vmatprep.subr.msk.bf16.mxu1 %vm2645_vm8, %v2529_v5  ;;  %v412_v44 = vld [vmem:[#allocation6 + $0xc0] sm:$0xff]  ;;  %v413_v46 = vld [vmem:[#allocation6 + $0xc8] sm:$0xff]  ;;  %v236_v47 = vld [vmem:[#allocation6 + $0x50] sm:$0xff] }
  0x35   :  { %v414_v48 = vld [vmem:[#allocation6 + $0xd0] sm:$0xff]  ;;  %v237_v49 = vld [vmem:[#allocation6 + $0x58] sm:$0xff]  ;;  %v238_v51 = vld [vmem:[#allocation6 + $0x60] sm:$0xff] }
  0x36   :  { %2259 = vmatpush3.bf16.msk.msra.mxu0 %vm2645_vm8, %v2529_v5  ;;  %v415_v50 = vld [vmem:[#allocation6 + $0xd8] sm:$0xff]  ;;  %v416_v52 = vld [vmem:[#allocation6 + $0xe0] sm:$0xff]  ;;  %v239_v53 = vld [vmem:[#allocation6 + $0x68] sm:$0xff] }
  0x37   :  { %2291 = vmatpush3.bf16.msk.msra.mxu1 %vm2645_vm8, %v2529_v5  ;;  %2261 = vmatprep.subr.msk.bf16.mxu0 %vm2663_vm11, %v2529_v5  ;;  %v417_v54 = vld [vmem:[#allocation6 + $0xe8] sm:$0xff]  ;;  %v240_v55 = vld [vmem:[#allocation6 + $0x70] sm:$0xff]  ;;  %v241_v57 = vld [vmem:[#allocation6 + $0x78] sm:$0xff] }
  0x38   :  { %2293 = vmatprep.subr.msk.bf16.mxu1 %vm2663_vm11, %v2529_v5  ;;  %v418_v56 = vld [vmem:[#allocation6 + $0xf0] sm:$0xff]  ;;  %v419_v58 = vld [vmem:[#allocation6 + $0xf8] sm:$0xff]  ;;  %v582_v59 = vld [vmem:[#allocation6 + $0x100] sm:$0xff] }
  0x39   :  { %v590_v60 = vld [vmem:[#allocation6 + $0x140] sm:$0xff]  ;;  %v583_v61 = vld [vmem:[#allocation6 + $0x108] sm:$0xff]  ;;  %v584_v63 = vld [vmem:[#allocation6 + $0x110] sm:$0xff] }
  0x3a   :  { %2263 = vmatpush3.bf16.msk.msra.mxu0 %vm2663_vm11, %v2529_v5  ;;  %v591_v62 = vld [vmem:[#allocation6 + $0x148] sm:$0xff]  ;;  %v592_v0 = vld [vmem:[#allocation6 + $0x150] sm:$0xff]  ;;  %v585_v1 = vld [vmem:[#allocation6 + $0x118] sm:$0xff] }
  0x3b   :  { %2295 = vmatpush3.bf16.msk.msra.mxu1 %vm2663_vm11, %v2529_v5  ;;  %2265 = vmatprep.subr.msk.bf16.mxu0 %vm2681_vm14, %v2529_v5  ;;  %v593_v2 = vld [vmem:[#allocation6 + $0x158] sm:$0xff]  ;;  %v586_v3 = vld [vmem:[#allocation6 + $0x120] sm:$0xff]  ;;  %v587_v6 = vld [vmem:[#allocation6 + $0x128] sm:$0xff] }
  0x3c   :  { %2297 = vmatprep.subr.msk.bf16.mxu1 %vm2681_vm14, %v2529_v5  ;;  %v594_v4 = vld [vmem:[#allocation6 + $0x160] sm:$0xff]  ;;  %v588_v7 = vld [vmem:[#allocation6 + $0x130] sm:$0xff]  ;;  %v589_v9 = vld [vmem:[#allocation6 + $0x138] sm:$0xff] }
  0x3d   :  { %v596_v8 = vld [vmem:[#allocation6 + $0x170] sm:$0xff]  ;;  %v597_v10 = vld [vmem:[#allocation6 + $0x178] sm:$0xff] }
  0x3e   :  { %2267 = vmatpush3.bf16.msk.msra.mxu0 %vm2681_vm14, %v2529_v5 }
  0x3f   :  { %2299 = vmatpush3.bf16.msk.msra.mxu1 %vm2681_vm14, %v2529_v5  ;;  %2269 = vmatprep.subr.msk.bf16.mxu0 %vm2699_vm1, %v2529_v5 }
  0x40   :  { %2301 = vmatprep.subr.msk.bf16.mxu1 %vm2699_vm1, %v2529_v5 }
  0x42   :  { %2271 = vmatpush3.bf16.msk.msra.mxu0 %vm2699_vm1, %v2529_v5 }
  0x43   :  { %2303 = vmatpush3.bf16.msk.msra.mxu1 %vm2699_vm1, %v2529_v5  ;;  %2273 = vmatprep.subr.msk.bf16.mxu0 %vm2717_vm6, %v2529_v5 }
  0x44   :  { %2305 = vmatprep.subr.msk.bf16.mxu1 %vm2717_vm6, %v2529_v5 }
  0x46   :  { %2275 = vmatpush3.bf16.msk.msra.mxu0 %vm2717_vm6, %v2529_v5 }
  0x47   :  { %2307 = vmatpush3.bf16.msk.msra.mxu1 %vm2717_vm6, %v2529_v5  ;;  %2277 = vmatprep.subr.msk.bf16.mxu0 %vm2733_vm10, %v2529_v5 }
  0x48   :  { %2309 = vmatprep.subr.msk.bf16.mxu1 %vm2733_vm10, %v2529_v5 }
  0x4a   :  { %2279 = vmatpush3.bf16.msk.msra.mxu0 %vm2733_vm10, %v2529_v5 }
  0x4b   :  { %2311 = vmatpush3.bf16.msk.msra.mxu1 %vm2733_vm10, %v2529_v5  ;;  %2313 = vmatprep.subr.msk.bf16.mxu0 %vm2617_vm4, %v2529_v5 }
  0x4c   :  { %2440 = vmatprep.subr.msk.bf16.mxu1 %vm2617_vm4, %v2529_v5 }
  0x4d   :  { %1945 = vmatmul.mubr.f32.vlgmr.msra.gmra.mrb[0].mxu0 %v227_v29 }
  0x4e   :  { %2001 = vmatmul.mubr.f32.vlgmr.msra.gmra.mrb[0].mxu1 %v405_v30  ;;  %2315 = vmatpush3.bf16.msk.msra.mxu0 %vm2617_vm4, %v2529_v5 }
  0x4f   :  { %2448 = vmatpush3.bf16.msk.msra.mxu1 %vm2617_vm4, %v2529_v5  ;;  %1947 = vmatprep.mubr.f32.mxu0 %v228_v31 }
  0x50   :  { %2003 = vmatprep.mubr.f32.mxu1 %v406_v32  ;;  %2317 = vmatprep.subr.msk.bf16.mxu0 %vm2629_vm5, %v2529_v5 }
  0x51   :  { %2441 = vmatprep.subr.msk.bf16.mxu1 %vm2629_vm5, %v2529_v5  ;;  %1948 = vmatmul.mubr.f32.gmra.mrb[2].mxu0 %v229_v33 }
  0x52   :  { %2004 = vmatmul.mubr.f32.gmra.mrb[2].mxu1 %v407_v34  ;;  %2319 = vmatpush3.bf16.msk.msra.mxu0 %vm2629_vm5, %v2529_v5 }
  0x53   :  { %2449 = vmatpush3.bf16.msk.msra.mxu1 %vm2629_vm5, %v2529_v5  ;;  %1950 = vmatprep.mubr.f32.mxu0 %v230_v35 }
  0x54   :  { %2006 = vmatprep.mubr.f32.mxu1 %v408_v36  ;;  %2321 = vmatprep.subr.msk.bf16.mxu0 %vm2645_vm8, %v2529_v5 }
  0x55   :  { %2442 = vmatprep.subr.msk.bf16.mxu1 %vm2645_vm8, %v2529_v5  ;;  %1951 = vmatmul.mubr.f32.gmra.mrb[4].mxu0 %v231_v37 }
  0x56   :  { %2007 = vmatmul.mubr.f32.gmra.mrb[4].mxu1 %v409_v38  ;;  %2323 = vmatpush3.bf16.msk.msra.mxu0 %vm2645_vm8, %v2529_v5 }
  0x57   :  { %2450 = vmatpush3.bf16.msk.msra.mxu1 %vm2645_vm8, %v2529_v5  ;;  %1953 = vmatprep.mubr.f32.mxu0 %v232_v39 }
  0x58   :  { %2009 = vmatprep.mubr.f32.mxu1 %v410_v40  ;;  %2325 = vmatprep.subr.msk.bf16.mxu0 %vm2663_vm11, %v2529_v5 }
  0x59   :  { %2443 = vmatprep.subr.msk.bf16.mxu1 %vm2663_vm11, %v2529_v5  ;;  %1954 = vmatmul.mubr.f32.gmra.mrb[6].mxu0 %v233_v41 }
  0x5a   :  { %2010 = vmatmul.mubr.f32.gmra.mrb[6].mxu1 %v411_v42  ;;  %2327 = vmatpush3.bf16.msk.msra.mxu0 %vm2663_vm11, %v2529_v5 }
  0x5b   :  { %2451 = vmatpush3.bf16.msk.msra.mxu1 %vm2663_vm11, %v2529_v5  ;;  %1956 = vmatprep.mubr.f32.mxu0 %v234_v43 }
  0x5c   :  { %2012 = vmatprep.mubr.f32.mxu1 %v412_v44  ;;  %2329 = vmatprep.subr.msk.bf16.mxu0 %vm2681_vm14, %v2529_v5 }
  0x5d   :  { %2444 = vmatprep.subr.msk.bf16.mxu1 %vm2681_vm14, %v2529_v5  ;;  %1957 = vmatmul.mubr.f32.gmra.mrb[8].mxu0 %v235_v45 }
  0x5e   :  { %2013 = vmatmul.mubr.f32.gmra.mrb[8].mxu1 %v413_v46  ;;  %2331 = vmatpush3.bf16.msk.msra.mxu0 %vm2681_vm14, %v2529_v5 }
  0x5f   :  { %2452 = vmatpush3.bf16.msk.msra.mxu1 %vm2681_vm14, %v2529_v5  ;;  %1959 = vmatprep.mubr.f32.mxu0 %v236_v47 }
  0x60   :  { %2015 = vmatprep.mubr.f32.mxu1 %v414_v48  ;;  %2333 = vmatprep.subr.msk.bf16.mxu0 %vm2699_vm1, %v2529_v5 }
  0x61   :  { %2445 = vmatprep.subr.msk.bf16.mxu1 %vm2699_vm1, %v2529_v5  ;;  %1960 = vmatmul.mubr.f32.gmra.mrb[10].mxu0 %v237_v49 }
  0x62   :  { %2016 = vmatmul.mubr.f32.gmra.mrb[10].mxu1 %v415_v50  ;;  %2335 = vmatpush3.bf16.msk.msra.mxu0 %vm2699_vm1, %v2529_v5 }
  0x63   :  { %2453 = vmatpush3.bf16.msk.msra.mxu1 %vm2699_vm1, %v2529_v5  ;;  %1962 = vmatprep.mubr.f32.mxu0 %v238_v51 }
  0x64   :  { %2018 = vmatprep.mubr.f32.mxu1 %v416_v52  ;;  %2337 = vmatprep.subr.msk.bf16.mxu0 %vm2717_vm6, %v2529_v5 }
  0x65   :  { %2446 = vmatprep.subr.msk.bf16.mxu1 %vm2717_vm6, %v2529_v5  ;;  %1963 = vmatmul.mubr.f32.gmra.mrb[12].mxu0 %v239_v53 }
  0x66   :  { %2019 = vmatmul.mubr.f32.gmra.mrb[12].mxu1 %v417_v54  ;;  %2339 = vmatpush3.bf16.msk.msra.mxu0 %vm2717_vm6, %v2529_v5 }
  0x67   :  { %2454 = vmatpush3.bf16.msk.msra.mxu1 %vm2717_vm6, %v2529_v5  ;;  %1965 = vmatprep.mubr.f32.mxu0 %v240_v55 }
  0x68   :  { %2021 = vmatprep.mubr.f32.mxu1 %v418_v56  ;;  %2341 = vmatprep.subr.msk.bf16.mxu0 %vm2733_vm10, %v2529_v5 }
  0x69   :  { %2447 = vmatprep.subr.msk.bf16.mxu1 %vm2733_vm10, %v2529_v5  ;;  %1966 = vmatmul.mubr.f32.gmra.mrb[14].mxu0 %v241_v57 }
  0x6a   :  { %2022 = vmatmul.mubr.f32.gmra.mrb[14].mxu1 %v419_v58  ;;  %2343 = vmatpush3.bf16.msk.msra.mxu0 %vm2733_vm10, %v2529_v5 }
  0x6b   :  { %2455 = vmatpush3.bf16.msk.msra.mxu1 %vm2733_vm10, %v2529_v5  ;;  %2056 = vmatprep.mubr.f32.mxu0 %v582_v59  ;;  %v595_v5 = vld [vmem:[#allocation6 + $0x168] sm:$0xff] }
  0x6c   :  { %2068 = vmatprep.mubr.f32.mxu1 %v590_v60 }
  0x6d   :  { %2057 = vmatmul.mubr.f32.vlgmr.msra.gmra.mrb[16].mxu0 %v583_v61 }
  0x6e   :  { %2069 = vmatmul.mubr.f32.vlgmr.msra.gmra.mrb[16].mxu1 %v591_v62  ;;  %2059 = vmatprep.mubr.f32.mxu0 %v584_v63 }
  0x6f   :  { %2071 = vmatprep.mubr.f32.mxu1 %v592_v0 }
  0x71   :  { %2060 = vmatmul.mubr.f32.gmra.mrb[18].mxu0 %v585_v1 }
  0x72   :  { %2072 = vmatmul.mubr.f32.gmra.mrb[18].mxu1 %v593_v2  ;;  %2062 = vmatprep.mubr.f32.mxu0 %v586_v3 }
  0x73   :  { %2074 = vmatprep.mubr.f32.mxu1 %v594_v4 }
  0x75   :  { %2063 = vmatmul.mubr.f32.gmra.mrb[20].mxu0 %v587_v6 }
  0x76   :  { %2075 = vmatmul.mubr.f32.gmra.mrb[20].mxu1 %v595_v5  ;;  %2065 = vmatprep.mubr.f32.mxu0 %v588_v7 }
  0x77   :  { %2077 = vmatprep.mubr.f32.mxu1 %v596_v8 }
  0x79   :  { %2066 = vmatmul.mubr.f32.gmra.mrb[22].mxu0 %v589_v9 }
  0x7a   :  { %2078 = vmatmul.mubr.f32.gmra.mrb[22].mxu1 %v597_v10 }
 0x120   :  { %v1946_v11 = vpop.f32.mrb[0].mxu0 }
 0x121   :  { %v2002_v12 = vpop.f32.mrb[0].mxu1  ;;  %388 = vst [vmem:[#allocation6 + $0x8] sm:$0xff] %v1946_v11  ;;  %v308_v13 = vpop.f32.mrb[1].mxu0 }
 0x122   :  { %566 = vst [vmem:[#allocation6 + $0x88] sm:$0xff] %v2002_v12  ;;  %v486_v14 = vpop.f32.mrb[1].mxu1  ;;  %387 = vst [vmem:[#allocation6] sm:$0xff] %v308_v13 }
 0x123   :  { %565 = vst [vmem:[#allocation6 + $0x80] sm:$0xff] %v486_v14 }
 0x124   :  { %v1949_v15 = vpop.f32.mrb[2].mxu0 }
 0x125   :  { %v2005_v16 = vpop.f32.mrb[2].mxu1  ;;  %390 = vst [vmem:[#allocation6 + $0x18] sm:$0xff] %v1949_v15  ;;  %v318_v17 = vpop.f32.mrb[3].mxu0 }
 0x126   :  { %568 = vst [vmem:[#allocation6 + $0x98] sm:$0xff] %v2005_v16  ;;  %v496_v18 = vpop.f32.mrb[3].mxu1  ;;  %389 = vst [vmem:[#allocation6 + $0x10] sm:$0xff] %v318_v17 }
 0x127   :  { %567 = vst [vmem:[#allocation6 + $0x90] sm:$0xff] %v496_v18 }
 0x128   :  { %v1952_v19 = vpop.f32.mrb[4].mxu0 }
 0x129   :  { %v2008_v20 = vpop.f32.mrb[4].mxu1  ;;  %392 = vst [vmem:[#allocation6 + $0x28] sm:$0xff] %v1952_v19  ;;  %v328_v21 = vpop.f32.mrb[5].mxu0 }
 0x12a   :  { %570 = vst [vmem:[#allocation6 + $0xa8] sm:$0xff] %v2008_v20  ;;  %v506_v22 = vpop.f32.mrb[5].mxu1  ;;  %391 = vst [vmem:[#allocation6 + $0x20] sm:$0xff] %v328_v21 }
 0x12b   :  { %569 = vst [vmem:[#allocation6 + $0xa0] sm:$0xff] %v506_v22 }
 0x12c   :  { %v1955_v23 = vpop.f32.mrb[6].mxu0 }
 0x12d   :  { %v2011_v24 = vpop.f32.mrb[6].mxu1  ;;  %394 = vst [vmem:[#allocation6 + $0x38] sm:$0xff] %v1955_v23  ;;  %v338_v25 = vpop.f32.mrb[7].mxu0 }
 0x12e   :  { %572 = vst [vmem:[#allocation6 + $0xb8] sm:$0xff] %v2011_v24  ;;  %v516_v26 = vpop.f32.mrb[7].mxu1  ;;  %393 = vst [vmem:[#allocation6 + $0x30] sm:$0xff] %v338_v25 }
 0x12f   :  { %571 = vst [vmem:[#allocation6 + $0xb0] sm:$0xff] %v516_v26 }
 0x130   :  { %v1958_v27 = vpop.f32.mrb[8].mxu0 }
 0x131   :  { %v2014_v28 = vpop.f32.mrb[8].mxu1  ;;  %396 = vst [vmem:[#allocation6 + $0x48] sm:$0xff] %v1958_v27  ;;  %v348_v29 = vpop.f32.mrb[9].mxu0 }
 0x132   :  { %574 = vst [vmem:[#allocation6 + $0xc8] sm:$0xff] %v2014_v28  ;;  %v526_v30 = vpop.f32.mrb[9].mxu1  ;;  %395 = vst [vmem:[#allocation6 + $0x40] sm:$0xff] %v348_v29 }
 0x133   :  { %573 = vst [vmem:[#allocation6 + $0xc0] sm:$0xff] %v526_v30 }
 0x134   :  { %v1961_v31 = vpop.f32.mrb[10].mxu0 }
 0x135   :  { %v2017_v32 = vpop.f32.mrb[10].mxu1  ;;  %398 = vst [vmem:[#allocation6 + $0x58] sm:$0xff] %v1961_v31  ;;  %v358_v33 = vpop.f32.mrb[11].mxu0 }
 0x136   :  { %576 = vst [vmem:[#allocation6 + $0xd8] sm:$0xff] %v2017_v32  ;;  %v536_v34 = vpop.f32.mrb[11].mxu1  ;;  %397 = vst [vmem:[#allocation6 + $0x50] sm:$0xff] %v358_v33 }
 0x137   :  { %575 = vst [vmem:[#allocation6 + $0xd0] sm:$0xff] %v536_v34 }
 0x138   :  { %v1964_v35 = vpop.f32.mrb[12].mxu0 }
 0x139   :  { %v2020_v36 = vpop.f32.mrb[12].mxu1  ;;  %400 = vst [vmem:[#allocation6 + $0x68] sm:$0xff] %v1964_v35  ;;  %v368_v37 = vpop.f32.mrb[13].mxu0 }
 0x13a   :  { %578 = vst [vmem:[#allocation6 + $0xe8] sm:$0xff] %v2020_v36  ;;  %v546_v38 = vpop.f32.mrb[13].mxu1  ;;  %399 = vst [vmem:[#allocation6 + $0x60] sm:$0xff] %v368_v37 }
 0x13b   :  { %577 = vst [vmem:[#allocation6 + $0xe0] sm:$0xff] %v546_v38 }
 0x13c   :  { %v1967_v39 = vpop.f32.mrb[14].mxu0 }
 0x13d   :  { %v2023_v40 = vpop.f32.mrb[14].mxu1  ;;  %402 = vst [vmem:[#allocation6 + $0x78] sm:$0xff] %v1967_v39  ;;  %v378_v41 = vpop.f32.mrb[15].mxu0 }
 0x13e   :  { %580 = vst [vmem:[#allocation6 + $0xf8] sm:$0xff] %v2023_v40  ;;  %v556_v42 = vpop.f32.mrb[15].mxu1  ;;  %401 = vst [vmem:[#allocation6 + $0x70] sm:$0xff] %v378_v41 }
 0x13f   :  { %579 = vst [vmem:[#allocation6 + $0xf0] sm:$0xff] %v556_v42 }
 0x140   :  { %v2058_v43 = vpop.f32.mrb[16].mxu0 }
 0x141   :  { %v2070_v44 = vpop.f32.mrb[16].mxu1  ;;  %744 = vst [vmem:[#allocation6 + $0x108] sm:$0xff] %v2058_v43  ;;  %v664_v45 = vpop.f32.mrb[17].mxu0 }
 0x142   :  { %752 = vst [vmem:[#allocation6 + $0x148] sm:$0xff] %v2070_v44  ;;  %v704_v46 = vpop.f32.mrb[17].mxu1  ;;  %743 = vst [vmem:[#allocation6 + $0x100] sm:$0xff] %v664_v45 }
 0x143   :  { %751 = vst [vmem:[#allocation6 + $0x140] sm:$0xff] %v704_v46 }
 0x144   :  { %v2061_v47 = vpop.f32.mrb[18].mxu0 }
 0x145   :  { %v2073_v48 = vpop.f32.mrb[18].mxu1  ;;  %746 = vst [vmem:[#allocation6 + $0x118] sm:$0xff] %v2061_v47  ;;  %v674_v49 = vpop.f32.mrb[19].mxu0 }
 0x146   :  { %754 = vst [vmem:[#allocation6 + $0x158] sm:$0xff] %v2073_v48  ;;  %v714_v50 = vpop.f32.mrb[19].mxu1  ;;  %745 = vst [vmem:[#allocation6 + $0x110] sm:$0xff] %v674_v49 }
 0x147   :  { %753 = vst [vmem:[#allocation6 + $0x150] sm:$0xff] %v714_v50 }
 0x148   :  { %v2064_v51 = vpop.f32.mrb[20].mxu0 }
 0x149   :  { %v2076_v52 = vpop.f32.mrb[20].mxu1  ;;  %748 = vst [vmem:[#allocation6 + $0x128] sm:$0xff] %v2064_v51  ;;  %v684_v53 = vpop.f32.mrb[21].mxu0 }
 0x14a   :  { %756 = vst [vmem:[#allocation6 + $0x168] sm:$0xff] %v2076_v52  ;;  %v724_v54 = vpop.f32.mrb[21].mxu1  ;;  %747 = vst [vmem:[#allocation6 + $0x120] sm:$0xff] %v684_v53 }
 0x14b   :  { %755 = vst [vmem:[#allocation6 + $0x160] sm:$0xff] %v724_v54 }
 0x14c   :  { %v2067_v55 = vpop.f32.mrb[22].mxu0 }
 0x14d   :  { %v2079_v56 = vpop.f32.mrb[22].mxu1  ;;  %750 = vst [vmem:[#allocation6 + $0x138] sm:$0xff] %v2067_v55  ;;  %v694_v57 = vpop.f32.mrb[23].mxu0 }
 0x14e   :  { %758 = vst [vmem:[#allocation6 + $0x178] sm:$0xff] %v2079_v56  ;;  %v734_v58 = vpop.f32.mrb[23].mxu1  ;;  %749 = vst [vmem:[#allocation6 + $0x130] sm:$0xff] %v694_v57 }
 0x14f   :  { %757 = vst [vmem:[#allocation6 + $0x170] sm:$0xff] %v734_v58 }
 0x150 PF:  { %761 = sbr.rel (!%p2595_p8) target bundleno = 630 (0x276), region = 21  ;;  %v845_v59 = vld [vmem:[#allocation6] sm:$0xff] (%p2595_p8)  ;;  %v846_v60 = vld [vmem:[#allocation6 + $0x8] sm:$0xff] (%p2595_p8)  ;;  %v762_v62 = vlaneseq (%p2595_p8)  ;;  %v847_v1 = vld [vmem:[#allocation6 + $0x10] sm:$0xff] (%p2595_p8)  ;;  %v2530_v21 = vmov (%p2595_p8), 1.0  }
 0x151   :  { %v1023_v61 = vld [vmem:[#allocation6 + $0x80] sm:$0xff] (%p2595_p8)  ;;  %v2344_v63 = vpack.c.bf16 (%p2595_p8), %v846_v60, %v845_v59  ;;  %v1024_v0 = vld [vmem:[#allocation6 + $0x88] sm:$0xff] (%p2595_p8)  ;;  %v848_v2 = vld [vmem:[#allocation6 + $0x18] sm:$0xff] (%p2595_p8) }
 0x152   :  { %v2376_v3 = vpack.c.bf16 (%p2595_p8), %v1024_v0, %v1023_v61  ;;  %v2348_v4 = vpack.c.bf16 (%p2595_p8), %v848_v2, %v847_v1  ;;  %v1025_v6 = vld [vmem:[#allocation6 + $0x90] sm:$0xff] (%p2595_p8)  ;;  %v1026_v5 = vld [vmem:[#allocation6 + $0x98] sm:$0xff] (%p2595_p8)  ;;  %v849_v7 = vld [vmem:[#allocation6 + $0x20] sm:$0xff] (%p2595_p8)  ;;  %v2853_v8 = vshrl.u32 (%p2595_p8), %v762_v62, 7  ;;  %v2855_v9 = vand.u32 (%p2595_p8), 127, %v762_v62 }
 0x153   :  { %2345 = vmatprep.subr.bf16.mxu0 (%p2595_p8), %v2344_v63  ;;  %v2380_v10 = vpack.c.bf16 (%p2595_p8), %v1026_v5, %v1025_v6  ;;  %v850_v11 = vld [vmem:[#allocation6 + $0x28] sm:$0xff] (%p2595_p8)  ;;  %v1027_v12 = vld [vmem:[#allocation6 + $0xa0] sm:$0xff] (%p2595_p8)  ;;  %v851_v17 = vld [vmem:[#allocation6 + $0x30] sm:$0xff] (%p2595_p8) }
 0x154   :  { %v1028_v13 = vld [vmem:[#allocation6 + $0xa8] sm:$0xff] (%p2595_p8)  ;;  %2377 = vmatprep.subr.bf16.mxu1 (%p2595_p8), %v2376_v3  ;;  %2347 = vmatpush3.bf16.msra.mxu0 (%p2595_p8), %v2344_v63  ;;  %v2859_v14 = vadd.s32 (%p2595_p8), %v2855_v9, %v2853_v8  ;;  %v2352_v15 = vpack.c.bf16 (%p2595_p8), %v850_v11, %v849_v7  ;;  %v852_v18 = vld [vmem:[#allocation6 + $0x38] sm:$0xff] (%p2595_p8)  ;;  %v1029_v19 = vld [vmem:[#allocation6 + $0xb0] sm:$0xff] (%p2595_p8)  ;;  %v764_v46 = vadd.s32 (%p2595_p8), 8, %v2853_v8  ;;  %v765_v51 = vadd.s32 (%p2595_p8), 16, %v2853_v8 }
 0x155   :  { %2379 = vmatpush3.bf16.msra.mxu1 (%p2595_p8), %v2376_v3  ;;  %2349 = vmatprep.subr.bf16.mxu0 (%p2595_p8), %v2348_v4  ;;  %v2384_v16 = vpack.c.bf16 (%p2595_p8), %v1028_v13, %v1027_v12  ;;  %v1030_v20 = vld [vmem:[#allocation6 + $0xb8] sm:$0xff] (%p2595_p8)  ;;  %v2356_v22 = vpack.c.bf16 (%p2595_p8), %v852_v18, %v851_v17  ;;  %v853_v24 = vld [vmem:[#allocation6 + $0x40] sm:$0xff] (%p2595_p8)  ;;  %v854_v25 = vld [vmem:[#allocation6 + $0x48] sm:$0xff] (%p2595_p8)  ;;  %v766_v53 = vadd.s32 (%p2595_p8), 24, %v2853_v8  ;;  %v767_v56 = vadd.s32 (%p2595_p8), 32, %v2853_v8 }
 0x156   :  { %2381 = vmatprep.subr.bf16.mxu1 (%p2595_p8), %v2380_v10  ;;  %vm797_vm4 = vcmp.eq.s32.totalorder (%p2595_p8), %v2859_v14, 127  ;;  %v2388_v23 = vpack.c.bf16 (%p2595_p8), %v1030_v20, %v1029_v19  ;;  %v1031_v26 = vld [vmem:[#allocation6 + $0xc0] sm:$0xff] (%p2595_p8)  ;;  %v1032_v27 = vld [vmem:[#allocation6 + $0xc8] sm:$0xff] (%p2595_p8)  ;;  %v2360_v28 = vpack.c.bf16 (%p2595_p8), %v854_v25, %v853_v24  ;;  %v855_v30 = vld [vmem:[#allocation6 + $0x50] sm:$0xff] (%p2595_p8)  ;;  %v2871_v52 = vadd.s32 (%p2595_p8), %v2855_v9, %v764_v46 }
 0x157   :  { %2112 = vmatprep.mubr.msk.f32.mxu0 %vm797_vm4, %v2530_v21  ;;  %2168 = vmatprep.mubr.msk.f32.mxu1 %vm797_vm4, %v2530_v21  ;;  %v2392_v29 = vpack.c.bf16 %v1032_v27, %v1031_v26  ;;  %v856_v31 = vld [vmem:[#allocation6 + $0x58] sm:$0xff]  ;;  %v1033_v32 = vld [vmem:[#allocation6 + $0xd0] sm:$0xff]  ;;  %v857_v36 = vld [vmem:[#allocation6 + $0x60] sm:$0xff]  ;;  %v2875_v55 = vadd.s32 %v2855_v9, %v765_v51  ;;  %v2880_v59 = vadd.s32 %v2855_v9, %v766_v53  ;;  %v768_v60 = vadd.s32 40, %v2853_v8 }
 0x158   :  { %2351 = vmatpush3.bf16.msra.mxu0 %v2348_v4  ;;  %v1034_v33 = vld [vmem:[#allocation6 + $0xd8] sm:$0xff]  ;;  %v2364_v34 = vpack.c.bf16 %v856_v31, %v855_v30  ;;  %v858_v37 = vld [vmem:[#allocation6 + $0x68] sm:$0xff]  ;;  %v1035_v38 = vld [vmem:[#allocation6 + $0xe0] sm:$0xff]  ;;  %vm798_vm5 = vcmp.eq.s32.totalorder %v2871_v52, 127  ;;  %v2885_v62 = vadd.s32 %v2855_v9, %v767_v56  ;;  %v769_v63 = vadd.s32 48, %v2853_v8 }
 0x159   :  { %2383 = vmatpush3.bf16.msra.mxu1 %v2380_v10  ;;  %2353 = vmatprep.subr.bf16.mxu0 %v2352_v15  ;;  %v2396_v35 = vpack.c.bf16 %v1034_v33, %v1033_v32  ;;  %v1036_v39 = vld [vmem:[#allocation6 + $0xe8] sm:$0xff]  ;;  %v2368_v40 = vpack.c.bf16 %v858_v37, %v857_v36  ;;  %v859_v42 = vld [vmem:[#allocation6 + $0x70] sm:$0xff]  ;;  %v860_v43 = vld [vmem:[#allocation6 + $0x78] sm:$0xff]  ;;  %vm799_vm8 = vcmp.eq.s32.totalorder %v2875_v55, 127  ;;  %vm800_vm11 = vcmp.eq.s32.totalorder %v2880_v59, 127 }
 0x15a   :  { %2385 = vmatprep.subr.bf16.mxu1 %v2384_v16  ;;  %v2400_v41 = vpack.c.bf16 %v1036_v39, %v1035_v38  ;;  %v1037_v44 = vld [vmem:[#allocation6 + $0xf0] sm:$0xff]  ;;  %v1038_v45 = vld [vmem:[#allocation6 + $0xf8] sm:$0xff]  ;;  %v2372_v47 = vpack.c.bf16 %v860_v43, %v859_v42  ;;  %v1201_v49 = vld [vmem:[#allocation6 + $0x100] sm:$0xff]  ;;  %v2896_v2 = vadd.s32 %v2855_v9, %v768_v60  ;;  %v770_v3 = vadd.s32 56, %v2853_v8 }
 0x15b   :  { %v2404_v48 = vpack.c.bf16 %v1038_v45, %v1037_v44  ;;  %v1202_v50 = vld [vmem:[#allocation6 + $0x108] sm:$0xff]  ;;  %v1203_v57 = vld [vmem:[#allocation6 + $0x110] sm:$0xff]  ;;  %v1204_v58 = vld [vmem:[#allocation6 + $0x118] sm:$0xff]  ;;  %vm801_vm12 = vcmp.eq.s32.totalorder %v2885_v62, 127  ;;  %v2907_v6 = vadd.s32 %v2855_v9, %v769_v63  ;;  %v771_v5 = vadd.s32 64, %v2853_v8 }
 0x15c   :  { %2355 = vmatpush3.bf16.msra.mxu0 %v2352_v15  ;;  %v2408_v54 = vpack.c.bf16 %v1202_v50, %v1201_v49  ;;  %v2412_v61 = vpack.c.bf16 %v1204_v58, %v1203_v57  ;;  %v1205_v0 = vld [vmem:[#allocation6 + $0x120] sm:$0xff]  ;;  %v1206_v1 = vld [vmem:[#allocation6 + $0x128] sm:$0xff]  ;;  %v1207_v7 = vld [vmem:[#allocation6 + $0x130] sm:$0xff]  ;;  %vm802_vm13 = vcmp.eq.s32.totalorder %v2896_v2, 127  ;;  %v2918_v11 = vadd.s32 %v2855_v9, %v770_v3 }
 0x15d   :  { %2387 = vmatpush3.bf16.msra.mxu1 %v2384_v16  ;;  %2357 = vmatprep.subr.bf16.mxu0 %v2356_v22  ;;  %v2416_v4 = vpack.c.bf16 %v1206_v1, %v1205_v0  ;;  %v1208_v10 = vld [vmem:[#allocation6 + $0x138] sm:$0xff]  ;;  %v772_v12 = vadd.s32 72, %v2853_v8  ;;  %vm803_vm14 = vcmp.eq.s32.totalorder %v2907_v6, 127  ;;  %v2929_v15 = vadd.s32 %v2855_v9, %v771_v5  ;;  %v1209_v17 = vld [vmem:[#allocation6 + $0x140] sm:$0xff]  ;;  %v1210_v18 = vld [vmem:[#allocation6 + $0x148] sm:$0xff] }
 0x15e   :  { %2389 = vmatprep.subr.bf16.mxu1 %v2388_v23  ;;  %v2420_v13 = vpack.c.bf16 %v1208_v10, %v1207_v7  ;;  %v773_v16 = vadd.s32 80, %v2853_v8  ;;  %vm804_vm15 = vcmp.eq.s32.totalorder %v2918_v11, 127  ;;  %v774_v20 = vadd.s32 88, %v2853_v8  ;;  %v1211_v25 = vld [vmem:[#allocation6 + $0x150] sm:$0xff]  ;;  %v1212_v26 = vld [vmem:[#allocation6 + $0x158] sm:$0xff]  ;;  %v1213_v32 = vld [vmem:[#allocation6 + $0x160] sm:$0xff] }
 0x15f   :  { %v2940_v19 = vadd.s32 %v2855_v9, %v772_v12  ;;  %vm805_vm0 = vcmp.eq.s32.totalorder %v2929_v15, 127  ;;  %v775_v24 = vadd.s32 96, %v2853_v8  ;;  %v777_v31 = vadd.s32 112, %v2853_v8  ;;  %v1214_v33 = vld [vmem:[#allocation6 + $0x168] sm:$0xff]  ;;  %v1215_v38 = vld [vmem:[#allocation6 + $0x170] sm:$0xff] }
 0x160   :  { %2359 = vmatpush3.bf16.msra.mxu0 %v2356_v22  ;;  %v2424_v22 = vpack.c.bf16 %v1210_v18, %v1209_v17  ;;  %v792_v27 = vadd.s32 %v2855_v9, %v774_v20  ;;  %v2432_v36 = vpack.c.bf16 %v1214_v33, %v1213_v32 }
 0x161   :  { %2391 = vmatpush3.bf16.msra.mxu1 %v2388_v23  ;;  %2361 = vmatprep.subr.bf16.mxu0 %v2360_v28  ;;  %v2951_v23 = vadd.s32 %v2855_v9, %v773_v16  ;;  %vm806_vm1 = vcmp.eq.s32.totalorder %v2940_v19, 127  ;;  %v793_v30 = vadd.s32 %v2855_v9, %v775_v24  ;;  %v795_v37 = vadd.s32 %v2855_v9, %v777_v31 }
 0x162   :  { %2393 = vmatprep.subr.bf16.mxu1 %v2392_v29  ;;  %vm808_vm3 = vcmp.eq.s32.totalorder %v792_v27, 127 }
 0x163   :  { %vm807_vm2 = vcmp.eq.s32.totalorder %v2951_v23, 127  ;;  %vm809_vm6 = vcmp.eq.s32.totalorder %v793_v30, 127  ;;  %vm811_vm9 = vcmp.eq.s32.totalorder %v795_v37, 127 }
 0x164   :  { %2363 = vmatpush3.bf16.msra.mxu0 %v2360_v28  ;;  %v776_v28 = vadd.s32 104, %v2853_v8 }
 0x165   :  { %2395 = vmatpush3.bf16.msra.mxu1 %v2392_v29  ;;  %2365 = vmatprep.subr.bf16.mxu0 %v2364_v34  ;;  %v2428_v29 = vpack.c.bf16 %v1212_v26, %v1211_v25 }
 0x166   :  { %2397 = vmatprep.subr.bf16.mxu1 %v2396_v35 }
 0x168   :  { %2367 = vmatpush3.bf16.msra.mxu0 %v2364_v34  ;;  %v794_v34 = vadd.s32 %v2855_v9, %v776_v28 }
 0x169   :  { %2399 = vmatpush3.bf16.msra.mxu1 %v2396_v35  ;;  %2369 = vmatprep.subr.bf16.mxu0 %v2368_v40  ;;  %v778_v35 = vadd.s32 120, %v2853_v8  ;;  %v1216_v8 = vld [vmem:[#allocation6 + $0x178] sm:$0xff] }
 0x16a   :  { %2401 = vmatprep.subr.bf16.mxu1 %v2400_v41  ;;  %vm810_vm7 = vcmp.eq.s32.totalorder %v794_v34, 127 }
 0x16b   :  { %v796_v39 = vadd.s32 %v2855_v9, %v778_v35 }
 0x16c   :  { %2371 = vmatpush3.bf16.msra.mxu0 %v2368_v40  ;;  %v2436_v40 = vpack.c.bf16 %v1216_v8, %v1215_v38 }
 0x16d   :  { %2403 = vmatpush3.bf16.msra.mxu1 %v2400_v41  ;;  %2373 = vmatprep.subr.bf16.mxu0 %v2372_v47  ;;  %vm812_vm10 = vcmp.eq.s32.totalorder %v796_v39, 127 }
 0x16e   :  { %2405 = vmatprep.subr.bf16.mxu1 %v2404_v48 }
 0x170   :  { %2375 = vmatpush3.bf16.msra.mxu0 %v2372_v47 }
 0x171   :  { %2407 = vmatpush3.bf16.msra.mxu1 %v2404_v48  ;;  %2409 = vmatprep.subr.bf16.mxu0 %v2408_v54 }
 0x172   :  { %2456 = vmatprep.subr.bf16.mxu1 %v2408_v54 }
 0x173   :  { %2113 = vmatmul.mubr.msk.f32.vlgmr.msra.gmra.mrb[0].mxu0 %vm798_vm5, %v2530_v21 }
 0x174   :  { %2169 = vmatmul.mubr.msk.f32.vlgmr.msra.gmra.mrb[0].mxu1 %vm798_vm5, %v2530_v21  ;;  %2411 = vmatpush3.bf16.msra.mxu0 %v2408_v54 }
 0x175   :  { %2464 = vmatpush3.bf16.msra.mxu1 %v2408_v54  ;;  %2115 = vmatprep.mubr.msk.f32.mxu0 %vm799_vm8, %v2530_v21 }
 0x176   :  { %2171 = vmatprep.mubr.msk.f32.mxu1 %vm799_vm8, %v2530_v21  ;;  %2413 = vmatprep.subr.bf16.mxu0 %v2412_v61 }
 0x177   :  { %2116 = vmatmul.mubr.msk.f32.gmra.mrb[2].mxu0 %vm800_vm11, %v2530_v21  ;;  %2457 = vmatprep.subr.bf16.mxu1 %v2412_v61 }
 0x178   :  { %2172 = vmatmul.mubr.msk.f32.gmra.mrb[2].mxu1 %vm800_vm11, %v2530_v21  ;;  %2415 = vmatpush3.bf16.msra.mxu0 %v2412_v61 }
 0x179   :  { %2465 = vmatpush3.bf16.msra.mxu1 %v2412_v61  ;;  %2118 = vmatprep.mubr.msk.f32.mxu0 %vm801_vm12, %v2530_v21 }
 0x17a   :  { %2174 = vmatprep.mubr.msk.f32.mxu1 %vm801_vm12, %v2530_v21  ;;  %2417 = vmatprep.subr.bf16.mxu0 %v2416_v4 }
 0x17b   :  { %2119 = vmatmul.mubr.msk.f32.gmra.mrb[4].mxu0 %vm802_vm13, %v2530_v21  ;;  %2458 = vmatprep.subr.bf16.mxu1 %v2416_v4 }
 0x17c   :  { %2175 = vmatmul.mubr.msk.f32.gmra.mrb[4].mxu1 %vm802_vm13, %v2530_v21  ;;  %2419 = vmatpush3.bf16.msra.mxu0 %v2416_v4 }
 0x17d   :  { %2466 = vmatpush3.bf16.msra.mxu1 %v2416_v4  ;;  %2121 = vmatprep.mubr.msk.f32.mxu0 %vm803_vm14, %v2530_v21 }
 0x17e   :  { %2177 = vmatprep.mubr.msk.f32.mxu1 %vm803_vm14, %v2530_v21  ;;  %2421 = vmatprep.subr.bf16.mxu0 %v2420_v13 }
 0x17f   :  { %2122 = vmatmul.mubr.msk.f32.gmra.mrb[6].mxu0 %vm804_vm15, %v2530_v21  ;;  %2459 = vmatprep.subr.bf16.mxu1 %v2420_v13 }
 0x180   :  { %2178 = vmatmul.mubr.msk.f32.gmra.mrb[6].mxu1 %vm804_vm15, %v2530_v21  ;;  %2423 = vmatpush3.bf16.msra.mxu0 %v2420_v13 }
 0x181   :  { %2467 = vmatpush3.bf16.msra.mxu1 %v2420_v13  ;;  %2124 = vmatprep.mubr.msk.f32.mxu0 %vm805_vm0, %v2530_v21 }
 0x182   :  { %2180 = vmatprep.mubr.msk.f32.mxu1 %vm805_vm0, %v2530_v21  ;;  %2425 = vmatprep.subr.bf16.mxu0 %v2424_v22 }
 0x183   :  { %2125 = vmatmul.mubr.msk.f32.gmra.mrb[8].mxu0 %vm806_vm1, %v2530_v21  ;;  %2460 = vmatprep.subr.bf16.mxu1 %v2424_v22 }
 0x184   :  { %2181 = vmatmul.mubr.msk.f32.gmra.mrb[8].mxu1 %vm806_vm1, %v2530_v21  ;;  %2427 = vmatpush3.bf16.msra.mxu0 %v2424_v22 }
 0x185   :  { %2468 = vmatpush3.bf16.msra.mxu1 %v2424_v22  ;;  %2127 = vmatprep.mubr.msk.f32.mxu0 %vm807_vm2, %v2530_v21 }
 0x186   :  { %2183 = vmatprep.mubr.msk.f32.mxu1 %vm807_vm2, %v2530_v21  ;;  %2429 = vmatprep.subr.bf16.mxu0 %v2428_v29 }
 0x187   :  { %2128 = vmatmul.mubr.msk.f32.gmra.mrb[10].mxu0 %vm808_vm3, %v2530_v21  ;;  %2461 = vmatprep.subr.bf16.mxu1 %v2428_v29 }
 0x188   :  { %2184 = vmatmul.mubr.msk.f32.gmra.mrb[10].mxu1 %vm808_vm3, %v2530_v21  ;;  %2431 = vmatpush3.bf16.msra.mxu0 %v2428_v29 }
 0x189   :  { %2469 = vmatpush3.bf16.msra.mxu1 %v2428_v29  ;;  %2130 = vmatprep.mubr.msk.f32.mxu0 %vm809_vm6, %v2530_v21 }
 0x18a   :  { %2186 = vmatprep.mubr.msk.f32.mxu1 %vm809_vm6, %v2530_v21  ;;  %2433 = vmatprep.subr.bf16.mxu0 %v2432_v36 }
 0x18b   :  { %2131 = vmatmul.mubr.msk.f32.gmra.mrb[12].mxu0 %vm810_vm7, %v2530_v21  ;;  %2462 = vmatprep.subr.bf16.mxu1 %v2432_v36 }
 0x18c   :  { %2187 = vmatmul.mubr.msk.f32.gmra.mrb[12].mxu1 %vm810_vm7, %v2530_v21  ;;  %2435 = vmatpush3.bf16.msra.mxu0 %v2432_v36 }
 0x18d   :  { %2470 = vmatpush3.bf16.msra.mxu1 %v2432_v36  ;;  %2133 = vmatprep.mubr.msk.f32.mxu0 %vm811_vm9, %v2530_v21 }
 0x18e   :  { %2189 = vmatprep.mubr.msk.f32.mxu1 %vm811_vm9, %v2530_v21  ;;  %2437 = vmatprep.subr.bf16.mxu0 %v2436_v40 }
 0x18f   :  { %2134 = vmatmul.mubr.msk.f32.gmra.mrb[14].mxu0 %vm812_vm10, %v2530_v21  ;;  %2463 = vmatprep.subr.bf16.mxu1 %v2436_v40 }
 0x190   :  { %2190 = vmatmul.mubr.msk.f32.gmra.mrb[14].mxu1 %vm812_vm10, %v2530_v21  ;;  %2439 = vmatpush3.bf16.msra.mxu0 %v2436_v40 }
 0x191   :  { %2471 = vmatpush3.bf16.msra.mxu1 %v2436_v40  ;;  %2224 = vmatprep.mubr.msk.f32.mxu0 %vm797_vm4, %v2530_v21 }
 0x192   :  { %2236 = vmatprep.mubr.msk.f32.mxu1 %vm805_vm0, %v2530_v21 }
 0x193   :  { %2225 = vmatmul.mubr.msk.f32.vlgmr.msra.gmra.mrb[16].mxu0 %vm798_vm5, %v2530_v21 }
 0x194   :  { %2237 = vmatmul.mubr.msk.f32.vlgmr.msra.gmra.mrb[16].mxu1 %vm806_vm1, %v2530_v21  ;;  %2227 = vmatprep.mubr.msk.f32.mxu0 %vm799_vm8, %v2530_v21 }
 0x195   :  { %2239 = vmatprep.mubr.msk.f32.mxu1 %vm807_vm2, %v2530_v21 }
 0x197   :  { %2228 = vmatmul.mubr.msk.f32.gmra.mrb[18].mxu0 %vm800_vm11, %v2530_v21 }
 0x198   :  { %2240 = vmatmul.mubr.msk.f32.gmra.mrb[18].mxu1 %vm808_vm3, %v2530_v21  ;;  %2230 = vmatprep.mubr.msk.f32.mxu0 %vm801_vm12, %v2530_v21 }
 0x199   :  { %2242 = vmatprep.mubr.msk.f32.mxu1 %vm809_vm6, %v2530_v21 }
 0x19b   :  { %2231 = vmatmul.mubr.msk.f32.gmra.mrb[20].mxu0 %vm802_vm13, %v2530_v21 }
 0x19c   :  { %2243 = vmatmul.mubr.msk.f32.gmra.mrb[20].mxu1 %vm810_vm7, %v2530_v21  ;;  %2233 = vmatprep.mubr.msk.f32.mxu0 %vm803_vm14, %v2530_v21 }
 0x19d   :  { %2245 = vmatprep.mubr.msk.f32.mxu1 %vm811_vm9, %v2530_v21 }
 0x19f   :  { %2234 = vmatmul.mubr.msk.f32.gmra.mrb[22].mxu0 %vm804_vm15, %v2530_v21 }
 0x1a0   :  { %2246 = vmatmul.mubr.msk.f32.gmra.mrb[22].mxu1 %vm812_vm10, %v2530_v21 }
 0x246   :  { %v2114_v9 = vpop.f32.mrb[0].mxu0 }
 0x247   :  { %1007 = vst [vmem:[#allocation6 + $0x8] sm:$0xff] %v2114_v9  ;;  %v2170_v14 = vpop.f32.mrb[0].mxu1  ;;  %v927_v41 = vpop.f32.mrb[1].mxu0 }
 0x248   :  { %1185 = vst [vmem:[#allocation6 + $0x88] sm:$0xff] %v2170_v14  ;;  %1006 = vst [vmem:[#allocation6] sm:$0xff] %v927_v41  ;;  %v1105_v42 = vpop.f32.mrb[1].mxu1 }
 0x249   :  { %1184 = vst [vmem:[#allocation6 + $0x80] sm:$0xff] %v1105_v42 }
 0x24a   :  { %v2117_v43 = vpop.f32.mrb[2].mxu0 }
 0x24b   :  { %1009 = vst [vmem:[#allocation6 + $0x18] sm:$0xff] %v2117_v43  ;;  %v2173_v44 = vpop.f32.mrb[2].mxu1  ;;  %v937_v45 = vpop.f32.mrb[3].mxu0 }
 0x24c   :  { %1187 = vst [vmem:[#allocation6 + $0x98] sm:$0xff] %v2173_v44  ;;  %1008 = vst [vmem:[#allocation6 + $0x10] sm:$0xff] %v937_v45  ;;  %v1115_v46 = vpop.f32.mrb[3].mxu1 }
 0x24d   :  { %1186 = vst [vmem:[#allocation6 + $0x90] sm:$0xff] %v1115_v46 }
 0x24e   :  { %v2120_v47 = vpop.f32.mrb[4].mxu0 }
 0x24f   :  { %1011 = vst [vmem:[#allocation6 + $0x28] sm:$0xff] %v2120_v47  ;;  %v2176_v48 = vpop.f32.mrb[4].mxu1  ;;  %v947_v21 = vpop.f32.mrb[5].mxu0 }
 0x250   :  { %1189 = vst [vmem:[#allocation6 + $0xa8] sm:$0xff] %v2176_v48  ;;  %1010 = vst [vmem:[#allocation6 + $0x20] sm:$0xff] %v947_v21  ;;  %v1125_v49 = vpop.f32.mrb[5].mxu1 }
 0x251   :  { %1188 = vst [vmem:[#allocation6 + $0xa0] sm:$0xff] %v1125_v49 }
 0x252   :  { %v2123_v50 = vpop.f32.mrb[6].mxu0 }
 0x253   :  { %1013 = vst [vmem:[#allocation6 + $0x38] sm:$0xff] %v2123_v50  ;;  %v2179_v51 = vpop.f32.mrb[6].mxu1  ;;  %v957_v52 = vpop.f32.mrb[7].mxu0 }
 0x254   :  { %1191 = vst [vmem:[#allocation6 + $0xb8] sm:$0xff] %v2179_v51  ;;  %1012 = vst [vmem:[#allocation6 + $0x30] sm:$0xff] %v957_v52  ;;  %v1135_v53 = vpop.f32.mrb[7].mxu1 }
 0x255   :  { %1190 = vst [vmem:[#allocation6 + $0xb0] sm:$0xff] %v1135_v53 }
 0x256   :  { %v2126_v54 = vpop.f32.mrb[8].mxu0 }
 0x257   :  { %1015 = vst [vmem:[#allocation6 + $0x48] sm:$0xff] %v2126_v54  ;;  %v2182_v55 = vpop.f32.mrb[8].mxu1  ;;  %v967_v56 = vpop.f32.mrb[9].mxu0 }
 0x258   :  { %1193 = vst [vmem:[#allocation6 + $0xc8] sm:$0xff] %v2182_v55  ;;  %1014 = vst [vmem:[#allocation6 + $0x40] sm:$0xff] %v967_v56  ;;  %v1145_v57 = vpop.f32.mrb[9].mxu1 }
 0x259   :  { %1192 = vst [vmem:[#allocation6 + $0xc0] sm:$0xff] %v1145_v57 }
 0x25a   :  { %v2129_v58 = vpop.f32.mrb[10].mxu0 }
 0x25b   :  { %1017 = vst [vmem:[#allocation6 + $0x58] sm:$0xff] %v2129_v58  ;;  %v2185_v59 = vpop.f32.mrb[10].mxu1  ;;  %v977_v60 = vpop.f32.mrb[11].mxu0 }
 0x25c   :  { %1195 = vst [vmem:[#allocation6 + $0xd8] sm:$0xff] %v2185_v59  ;;  %1016 = vst [vmem:[#allocation6 + $0x50] sm:$0xff] %v977_v60  ;;  %v1155_v61 = vpop.f32.mrb[11].mxu1 }
 0x25d   :  { %1194 = vst [vmem:[#allocation6 + $0xd0] sm:$0xff] %v1155_v61 }
 0x25e   :  { %v2132_v62 = vpop.f32.mrb[12].mxu0 }
 0x25f   :  { %1019 = vst [vmem:[#allocation6 + $0x68] sm:$0xff] %v2132_v62  ;;  %v2188_v63 = vpop.f32.mrb[12].mxu1  ;;  %v987_v0 = vpop.f32.mrb[13].mxu0 }
 0x260   :  { %1197 = vst [vmem:[#allocation6 + $0xe8] sm:$0xff] %v2188_v63  ;;  %1018 = vst [vmem:[#allocation6 + $0x60] sm:$0xff] %v987_v0  ;;  %v1165_v1 = vpop.f32.mrb[13].mxu1 }
 0x261   :  { %1196 = vst [vmem:[#allocation6 + $0xe0] sm:$0xff] %v1165_v1 }
 0x262   :  { %v2135_v2 = vpop.f32.mrb[14].mxu0 }
 0x263   :  { %1021 = vst [vmem:[#allocation6 + $0x78] sm:$0xff] %v2135_v2  ;;  %v2191_v3 = vpop.f32.mrb[14].mxu1  ;;  %v997_v4 = vpop.f32.mrb[15].mxu0 }
 0x264   :  { %1199 = vst [vmem:[#allocation6 + $0xf8] sm:$0xff] %v2191_v3  ;;  %1020 = vst [vmem:[#allocation6 + $0x70] sm:$0xff] %v997_v4  ;;  %v1175_v6 = vpop.f32.mrb[15].mxu1 }
 0x265   :  { %1198 = vst [vmem:[#allocation6 + $0xf0] sm:$0xff] %v1175_v6 }
 0x266   :  { %v2226_v5 = vpop.f32.mrb[16].mxu0 }
 0x267   :  { %1363 = vst [vmem:[#allocation6 + $0x108] sm:$0xff] %v2226_v5  ;;  %v2238_v7 = vpop.f32.mrb[16].mxu1  ;;  %v1283_v10 = vpop.f32.mrb[17].mxu0 }
 0x268   :  { %1371 = vst [vmem:[#allocation6 + $0x148] sm:$0xff] %v2238_v7  ;;  %1362 = vst [vmem:[#allocation6 + $0x100] sm:$0xff] %v1283_v10  ;;  %v1323_v11 = vpop.f32.mrb[17].mxu1 }
 0x269   :  { %1370 = vst [vmem:[#allocation6 + $0x140] sm:$0xff] %v1323_v11 }
 0x26a   :  { %v2229_v12 = vpop.f32.mrb[18].mxu0 }
 0x26b   :  { %1365 = vst [vmem:[#allocation6 + $0x118] sm:$0xff] %v2229_v12  ;;  %v2241_v13 = vpop.f32.mrb[18].mxu1  ;;  %v1293_v15 = vpop.f32.mrb[19].mxu0 }
 0x26c   :  { %1373 = vst [vmem:[#allocation6 + $0x158] sm:$0xff] %v2241_v13  ;;  %1364 = vst [vmem:[#allocation6 + $0x110] sm:$0xff] %v1293_v15  ;;  %v1333_v16 = vpop.f32.mrb[19].mxu1 }
 0x26d   :  { %1372 = vst [vmem:[#allocation6 + $0x150] sm:$0xff] %v1333_v16 }
 0x26e   :  { %v2232_v17 = vpop.f32.mrb[20].mxu0 }
 0x26f   :  { %1367 = vst [vmem:[#allocation6 + $0x128] sm:$0xff] %v2232_v17  ;;  %v2244_v18 = vpop.f32.mrb[20].mxu1  ;;  %v1303_v19 = vpop.f32.mrb[21].mxu0 }
 0x270   :  { %1375 = vst [vmem:[#allocation6 + $0x168] sm:$0xff] %v2244_v18  ;;  %1366 = vst [vmem:[#allocation6 + $0x120] sm:$0xff] %v1303_v19  ;;  %v1343_v20 = vpop.f32.mrb[21].mxu1 }
 0x271   :  { %1374 = vst [vmem:[#allocation6 + $0x160] sm:$0xff] %v1343_v20 }
 0x272   :  { %v2235_v22 = vpop.f32.mrb[22].mxu0 }
 0x273   :  { %1369 = vst [vmem:[#allocation6 + $0x138] sm:$0xff] %v2235_v22  ;;  %v2247_v23 = vpop.f32.mrb[22].mxu1  ;;  %v1313_v24 = vpop.f32.mrb[23].mxu0 }
 0x274   :  { %1377 = vst [vmem:[#allocation6 + $0x178] sm:$0xff] %v2247_v23  ;;  %1368 = vst [vmem:[#allocation6 + $0x130] sm:$0xff] %v1313_v24  ;;  %v1353_v25 = vpop.f32.mrb[23].mxu1 }
 0x275   :  { %1376 = vst [vmem:[#allocation6 + $0x170] sm:$0xff] %v1353_v25 }
 0x276 PF:  { %1380 = sbr.rel (!%p2603_p9) target bundleno = 885 (0x375), region = 25  ;;  %v1381_v26 = vld [vmem:[#allocation6] sm:$0xff] (%p2603_p9)  ;;  %v1382_v27 = vld [vmem:[#allocation6 + $0x8] sm:$0xff] (%p2603_p9)  ;;  %v1383_v29 = vld [vmem:[#allocation6 + $0x10] sm:$0xff] (%p2603_p9) }
 0x277   :  { %1397 = vxpose.xlu0.b32.start [1/16] (%p2603_p9), %v1381_v26, 128  ;;  %v1446_v28 = vld [vmem:[#allocation6 + $0x80] sm:$0xff] (%p2603_p9)  ;;  %v1447_v30 = vld [vmem:[#allocation6 + $0x88] sm:$0xff] (%p2603_p9)  ;;  %v1384_v31 = vld [vmem:[#allocation6 + $0x18] sm:$0xff] (%p2603_p9) }
 0x278   :  { %1462 = vxpose.xlu1.b32.start [1/16] (%p2603_p9), %v1446_v28, 128  ;;  %v1448_v32 = vld [vmem:[#allocation6 + $0x90] sm:$0xff] (%p2603_p9)  ;;  %v1385_v33 = vld [vmem:[#allocation6 + $0x20] sm:$0xff] (%p2603_p9)  ;;  %v1449_v34 = vld [vmem:[#allocation6 + $0x98] sm:$0xff] (%p2603_p9) }
 0x279   :  { %v1386_v35 = vld [vmem:[#allocation6 + $0x28] sm:$0xff] (%p2603_p9)  ;;  %v1450_v36 = vld [vmem:[#allocation6 + $0xa0] sm:$0xff] (%p2603_p9)  ;;  %v1387_v37 = vld [vmem:[#allocation6 + $0x30] sm:$0xff] (%p2603_p9) }
 0x27a   :  { %v1451_v38 = vld [vmem:[#allocation6 + $0xa8] sm:$0xff] (%p2603_p9)  ;;  %v1388_v8 = vld [vmem:[#allocation6 + $0x38] sm:$0xff] (%p2603_p9)  ;;  %v1452_v39 = vld [vmem:[#allocation6 + $0xb0] sm:$0xff] (%p2603_p9) }
 0x27b   :  { %1398 = vxpose.xlu0.b32.cont [2/16] (%p2603_p9), %v1382_v27, 128  ;;  %v1389_v40 = vld [vmem:[#allocation6 + $0x40] sm:$0xff] (%p2603_p9)  ;;  %v1453_v9 = vld [vmem:[#allocation6 + $0xb8] sm:$0xff] (%p2603_p9)  ;;  %v1390_v14 = vld [vmem:[#allocation6 + $0x48] sm:$0xff] (%p2603_p9) }
 0x27c   :  { %1463 = vxpose.xlu1.b32.cont [2/16] (%p2603_p9), %v1447_v30, 128  ;;  %v1454_v41 = vld [vmem:[#allocation6 + $0xc0] sm:$0xff] (%p2603_p9)  ;;  %v1391_v42 = vld [vmem:[#allocation6 + $0x50] sm:$0xff] (%p2603_p9)  ;;  %v1455_v43 = vld [vmem:[#allocation6 + $0xc8] sm:$0xff] (%p2603_p9) }
 0x27d   :  { %v1392_v44 = vld [vmem:[#allocation6 + $0x58] sm:$0xff]  ;;  %v1456_v45 = vld [vmem:[#allocation6 + $0xd0] sm:$0xff]  ;;  %v1393_v46 = vld [vmem:[#allocation6 + $0x60] sm:$0xff] }
 0x27e   :  { %v1457_v47 = vld [vmem:[#allocation6 + $0xd8] sm:$0xff]  ;;  %v1394_v48 = vld [vmem:[#allocation6 + $0x68] sm:$0xff]  ;;  %v1458_v21 = vld [vmem:[#allocation6 + $0xe0] sm:$0xff] }
 0x27f   :  { %1399 = vxpose.xlu0.b32.cont [3/16] %v1383_v29, 128  ;;  %v1395_v49 = vld [vmem:[#allocation6 + $0x70] sm:$0xff]  ;;  %v1459_v50 = vld [vmem:[#allocation6 + $0xe8] sm:$0xff]  ;;  %v1396_v51 = vld [vmem:[#allocation6 + $0x78] sm:$0xff] }
 0x280   :  { %1464 = vxpose.xlu1.b32.cont [3/16] %v1448_v32, 128  ;;  %v1460_v52 = vld [vmem:[#allocation6 + $0xf0] sm:$0xff]  ;;  %v1511_v53 = vld [vmem:[#allocation6 + $0x100] sm:$0xff]  ;;  %v1461_v54 = vld [vmem:[#allocation6 + $0xf8] sm:$0xff] }
 0x281   :  { %v1512_v55 = vld [vmem:[#allocation6 + $0x108] sm:$0xff]  ;;  %v1513_v56 = vld [vmem:[#allocation6 + $0x110] sm:$0xff]  ;;  %v1514_v57 = vld [vmem:[#allocation6 + $0x118] sm:$0xff] }
 0x282   :  { %v1515_v58 = vld [vmem:[#allocation6 + $0x120] sm:$0xff]  ;;  %v1516_v59 = vld [vmem:[#allocation6 + $0x128] sm:$0xff]  ;;  %v1517_v60 = vld [vmem:[#allocation6 + $0x130] sm:$0xff] }
 0x283   :  { %1400 = vxpose.xlu0.b32.cont [4/16] %v1384_v31, 128  ;;  %v1518_v61 = vld [vmem:[#allocation6 + $0x138] sm:$0xff]  ;;  %v1519_v62 = vld [vmem:[#allocation6 + $0x140] sm:$0xff]  ;;  %v1520_v63 = vld [vmem:[#allocation6 + $0x148] sm:$0xff] }
 0x284   :  { %1465 = vxpose.xlu1.b32.cont [4/16] %v1449_v34, 128  ;;  %v1521_v0 = vld [vmem:[#allocation6 + $0x150] sm:$0xff]  ;;  %v1522_v1 = vld [vmem:[#allocation6 + $0x158] sm:$0xff]  ;;  %v1523_v2 = vld [vmem:[#allocation6 + $0x160] sm:$0xff] }
 0x285   :  { %v1524_v3 = vld [vmem:[#allocation6 + $0x168] sm:$0xff]  ;;  %v1525_v4 = vld [vmem:[#allocation6 + $0x170] sm:$0xff]  ;;  %v1526_v6 = vld [vmem:[#allocation6 + $0x178] sm:$0xff] }
 0x287   :  { %1401 = vxpose.xlu0.b32.cont [5/16] %v1385_v33, 128 }
 0x288   :  { %1466 = vxpose.xlu1.b32.cont [5/16] %v1450_v36, 128 }
 0x28b   :  { %1402 = vxpose.xlu0.b32.cont [6/16] %v1386_v35, 128 }
 0x28c   :  { %1467 = vxpose.xlu1.b32.cont [6/16] %v1451_v38, 128 }
 0x28f   :  { %1403 = vxpose.xlu0.b32.cont [7/16] %v1387_v37, 128 }
 0x290   :  { %1468 = vxpose.xlu1.b32.cont [7/16] %v1452_v39, 128 }
 0x293   :  { %1404 = vxpose.xlu0.b32.cont [8/16] %v1388_v8, 128 }
 0x294   :  { %1469 = vxpose.xlu1.b32.cont [8/16] %v1453_v9, 128 }
 0x297   :  { %1405 = vxpose.xlu0.b32.cont [9/16] %v1389_v40, 128 }
 0x298   :  { %1470 = vxpose.xlu1.b32.cont [9/16] %v1454_v41, 128 }
 0x29b   :  { %1406 = vxpose.xlu0.b32.cont [10/16] %v1390_v14, 128 }
 0x29c   :  { %1471 = vxpose.xlu1.b32.cont [10/16] %v1455_v43, 128 }
 0x29f   :  { %1407 = vxpose.xlu0.b32.cont [11/16] %v1391_v42, 128 }
 0x2a0   :  { %1472 = vxpose.xlu1.b32.cont [11/16] %v1456_v45, 128 }
 0x2a3   :  { %1408 = vxpose.xlu0.b32.cont [12/16] %v1392_v44, 128 }
 0x2a4   :  { %1473 = vxpose.xlu1.b32.cont [12/16] %v1457_v47, 128 }
 0x2a7   :  { %1409 = vxpose.xlu0.b32.cont [13/16] %v1393_v46, 128 }
 0x2a8   :  { %1474 = vxpose.xlu1.b32.cont [13/16] %v1458_v21, 128 }
 0x2ab   :  { %1410 = vxpose.xlu0.b32.cont [14/16] %v1394_v48, 128 }
 0x2ac   :  { %1475 = vxpose.xlu1.b32.cont [14/16] %v1459_v50, 128 }
 0x2af   :  { %1411 = vxpose.xlu0.b32.cont [15/16] %v1395_v49, 128 }
 0x2b0   :  { %1476 = vxpose.xlu1.b32.cont [15/16] %v1460_v52, 128 }
 0x2b3   :  { %1412 = vxpose.xlu0.b32.end [16/16] %v1396_v51, 128 }
 0x2b4   :  { %1477 = vxpose.xlu1.b32.end [16/16] %v1461_v54, 128 }
 0x2b7   :  { %1527 = vxpose.xlu0.b32.start [1/16] %v1511_v53, 128 }
 0x2bb   :  { %1528 = vxpose.xlu0.b32.cont [2/16] %v1512_v55, 128 }
 0x2bf   :  { %1529 = vxpose.xlu0.b32.cont [3/16] %v1513_v56, 128 }
 0x2c3   :  { %1530 = vxpose.xlu0.b32.cont [4/16] %v1514_v57, 128 }
 0x2c7   :  { %1531 = vxpose.xlu0.b32.cont [5/16] %v1515_v58, 128 }
 0x2cb   :  { %1532 = vxpose.xlu0.b32.cont [6/16] %v1516_v59, 128 }
 0x2cf   :  { %1533 = vxpose.xlu0.b32.cont [7/16] %v1517_v60, 128 }
 0x2d3   :  { %1534 = vxpose.xlu0.b32.cont [8/16] %v1518_v61, 128 }
 0x2d7   :  { %1535 = vxpose.xlu0.b32.cont [9/16] %v1519_v62, 128 }
 0x2db   :  { %1536 = vxpose.xlu0.b32.cont [10/16] %v1520_v63, 128 }
 0x2df   :  { %1537 = vxpose.xlu0.b32.cont [11/16] %v1521_v0, 128 }
 0x2e3   :  { %1538 = vxpose.xlu0.b32.cont [12/16] %v1522_v1, 128 }
 0x2e7   :  { %1539 = vxpose.xlu0.b32.cont [13/16] %v1523_v2, 128 }
 0x2eb   :  { %1540 = vxpose.xlu0.b32.cont [14/16] %v1524_v3, 128 }
 0x2ef   :  { %1541 = vxpose.xlu0.b32.cont [15/16] %v1525_v4, 128 }
 0x2f3   :  { %1542 = vxpose.xlu0.b32.end [16/16] %v1526_v6, 128 }
 0x2f7   :  { %v1413_v5 = vpop.trf.xlu0 }
 0x2f8   :  { %1429 = vst [vmem:[#allocation6] sm:$0xff] %v1413_v5  ;;  %v1478_v10 = vpop.trf.xlu1 }
 0x2f9   :  { %1494 = vst [vmem:[#allocation6 + $0x80] sm:$0xff] %v1478_v10 }
 0x2fb   :  { %v1414_v7 = vpop.trf.xlu0 }
 0x2fc   :  { %1430 = vst [vmem:[#allocation6 + $0x8] sm:$0xff] %v1414_v7  ;;  %v1479_v12 = vpop.trf.xlu1 }
 0x2fd   :  { %1495 = vst [vmem:[#allocation6 + $0x88] sm:$0xff] %v1479_v12 }
 0x2ff   :  { %v1415_v11 = vpop.trf.xlu0 }
 0x300   :  { %1431 = vst [vmem:[#allocation6 + $0x10] sm:$0xff] %v1415_v11  ;;  %v1480_v15 = vpop.trf.xlu1 }
 0x301   :  { %1496 = vst [vmem:[#allocation6 + $0x90] sm:$0xff] %v1480_v15 }
 0x303   :  { %v1416_v13 = vpop.trf.xlu0 }
 0x304   :  { %1432 = vst [vmem:[#allocation6 + $0x18] sm:$0xff] %v1416_v13  ;;  %v1481_v17 = vpop.trf.xlu1 }
 0x305   :  { %1497 = vst [vmem:[#allocation6 + $0x98] sm:$0xff] %v1481_v17 }
 0x307   :  { %v1417_v16 = vpop.trf.xlu0 }
 0x308   :  { %1433 = vst [vmem:[#allocation6 + $0x20] sm:$0xff] %v1417_v16  ;;  %v1482_v19 = vpop.trf.xlu1 }
 0x309   :  { %1498 = vst [vmem:[#allocation6 + $0xa0] sm:$0xff] %v1482_v19 }
 0x30b   :  { %v1418_v18 = vpop.trf.xlu0 }
 0x30c   :  { %1434 = vst [vmem:[#allocation6 + $0x28] sm:$0xff] %v1418_v18  ;;  %v1483_v22 = vpop.trf.xlu1 }
 0x30d   :  { %1499 = vst [vmem:[#allocation6 + $0xa8] sm:$0xff] %v1483_v22 }
 0x30f   :  { %v1419_v20 = vpop.trf.xlu0 }
 0x310   :  { %1435 = vst [vmem:[#allocation6 + $0x30] sm:$0xff] %v1419_v20  ;;  %v1484_v24 = vpop.trf.xlu1 }
 0x311   :  { %1500 = vst [vmem:[#allocation6 + $0xb0] sm:$0xff] %v1484_v24 }
 0x313   :  { %v1420_v23 = vpop.trf.xlu0 }
 0x314   :  { %1436 = vst [vmem:[#allocation6 + $0x38] sm:$0xff] %v1420_v23  ;;  %v1485_v26 = vpop.trf.xlu1 }
 0x315   :  { %1501 = vst [vmem:[#allocation6 + $0xb8] sm:$0xff] %v1485_v26 }
 0x317   :  { %v1421_v25 = vpop.trf.xlu0 }
 0x318   :  { %1437 = vst [vmem:[#allocation6 + $0x40] sm:$0xff] %v1421_v25  ;;  %v1486_v28 = vpop.trf.xlu1 }
 0x319   :  { %1502 = vst [vmem:[#allocation6 + $0xc0] sm:$0xff] %v1486_v28 }
 0x31b   :  { %v1422_v27 = vpop.trf.xlu0 }
 0x31c   :  { %1438 = vst [vmem:[#allocation6 + $0x48] sm:$0xff] %v1422_v27  ;;  %v1487_v30 = vpop.trf.xlu1 }
 0x31d   :  { %1503 = vst [vmem:[#allocation6 + $0xc8] sm:$0xff] %v1487_v30 }
 0x31f   :  { %v1423_v29 = vpop.trf.xlu0 }
 0x320   :  { %1439 = vst [vmem:[#allocation6 + $0x50] sm:$0xff] %v1423_v29  ;;  %v1488_v32 = vpop.trf.xlu1 }
 0x321   :  { %1504 = vst [vmem:[#allocation6 + $0xd0] sm:$0xff] %v1488_v32 }
 0x323   :  { %v1424_v31 = vpop.trf.xlu0 }
 0x324   :  { %1440 = vst [vmem:[#allocation6 + $0x58] sm:$0xff] %v1424_v31  ;;  %v1489_v34 = vpop.trf.xlu1 }
 0x325   :  { %1505 = vst [vmem:[#allocation6 + $0xd8] sm:$0xff] %v1489_v34 }
 0x327   :  { %v1425_v33 = vpop.trf.xlu0 }
 0x328   :  { %1441 = vst [vmem:[#allocation6 + $0x60] sm:$0xff] %v1425_v33  ;;  %v1490_v36 = vpop.trf.xlu1 }
 0x329   :  { %1506 = vst [vmem:[#allocation6 + $0xe0] sm:$0xff] %v1490_v36 }
 0x32b   :  { %v1426_v35 = vpop.trf.xlu0 }
 0x32c   :  { %1442 = vst [vmem:[#allocation6 + $0x68] sm:$0xff] %v1426_v35  ;;  %v1491_v38 = vpop.trf.xlu1 }
 0x32d   :  { %1507 = vst [vmem:[#allocation6 + $0xe8] sm:$0xff] %v1491_v38 }
 0x32f   :  { %v1427_v37 = vpop.trf.xlu0 }
 0x330   :  { %1443 = vst [vmem:[#allocation6 + $0x70] sm:$0xff] %v1427_v37  ;;  %v1492_v39 = vpop.trf.xlu1 }
 0x331   :  { %1508 = vst [vmem:[#allocation6 + $0xf0] sm:$0xff] %v1492_v39 }
 0x333   :  { %v1428_v8 = vpop.trf.xlu0 }
 0x334   :  { %1444 = vst [vmem:[#allocation6 + $0x78] sm:$0xff] %v1428_v8  ;;  %v1493_v9 = vpop.trf.xlu1 }
 0x335   :  { %1509 = vst [vmem:[#allocation6 + $0xf8] sm:$0xff] %v1493_v9 }
 0x337   :  { %v1543_v40 = vpop.trf.xlu0 }
 0x338   :  { %1559 = vst [vmem:[#allocation6 + $0x100] sm:$0xff] %v1543_v40 }
 0x33b   :  { %v1544_v14 = vpop.trf.xlu0 }
 0x33c   :  { %1560 = vst [vmem:[#allocation6 + $0x108] sm:$0xff] %v1544_v14 }
 0x33f   :  { %v1545_v41 = vpop.trf.xlu0 }
 0x340   :  { %1561 = vst [vmem:[#allocation6 + $0x110] sm:$0xff] %v1545_v41 }
 0x343   :  { %v1546_v42 = vpop.trf.xlu0 }
 0x344   :  { %1562 = vst [vmem:[#allocation6 + $0x118] sm:$0xff] %v1546_v42 }
 0x347   :  { %v1547_v43 = vpop.trf.xlu0 }
 0x348   :  { %1563 = vst [vmem:[#allocation6 + $0x120] sm:$0xff] %v1547_v43 }
 0x34b   :  { %v1548_v44 = vpop.trf.xlu0 }
 0x34c   :  { %1564 = vst [vmem:[#allocation6 + $0x128] sm:$0xff] %v1548_v44 }
 0x34f   :  { %v1549_v45 = vpop.trf.xlu0 }
 0x350   :  { %1565 = vst [vmem:[#allocation6 + $0x130] sm:$0xff] %v1549_v45 }
 0x353   :  { %v1550_v46 = vpop.trf.xlu0 }
 0x354   :  { %1566 = vst [vmem:[#allocation6 + $0x138] sm:$0xff] %v1550_v46 }
 0x357   :  { %v1551_v47 = vpop.trf.xlu0 }
 0x358   :  { %1567 = vst [vmem:[#allocation6 + $0x140] sm:$0xff] %v1551_v47 }
 0x35b   :  { %v1552_v48 = vpop.trf.xlu0 }
 0x35c   :  { %1568 = vst [vmem:[#allocation6 + $0x148] sm:$0xff] %v1552_v48 }
 0x35f   :  { %v1553_v21 = vpop.trf.xlu0 }
 0x360   :  { %1569 = vst [vmem:[#allocation6 + $0x150] sm:$0xff] %v1553_v21 }
 0x363   :  { %v1554_v49 = vpop.trf.xlu0 }
 0x364   :  { %1570 = vst [vmem:[#allocation6 + $0x158] sm:$0xff] %v1554_v49 }
 0x367   :  { %v1555_v50 = vpop.trf.xlu0 }
 0x368   :  { %1571 = vst [vmem:[#allocation6 + $0x160] sm:$0xff] %v1555_v50 }
 0x36b   :  { %v1556_v51 = vpop.trf.xlu0 }
 0x36c   :  { %1572 = vst [vmem:[#allocation6 + $0x168] sm:$0xff] %v1556_v51 }
 0x36f   :  { %v1557_v52 = vpop.trf.xlu0 }
 0x370   :  { %1573 = vst [vmem:[#allocation6 + $0x170] sm:$0xff] %v1557_v52 }
 0x373   :  { %v1558_v53 = vpop.trf.xlu0 }
 0x374   :  { %1574 = vst [vmem:[#allocation6 + $0x178] sm:$0xff] %v1558_v53 }
 0x375 PF:  { %s2531_s0 = smov [#allocation6]  }
 0x376   :  { %s1580_s17 = sshll.u32 %s2531_s0, 4  ;;  %s1581_s17 = int_to_ptr.vmem [resolvable:$true] %s1580_s17 }
 0x377   :  { %s2500_s18 = scalar_lea.vmem %s1581_s17, 6144  ;;  %p2505_p11 = scmp.lt.s32.totalorder %s1581_s17, %s1581_s17 }
 0x378   :  { %p2501_p10 = scmp.ne.s32.totalorder %s1581_s17, %s2500_s18  ;;  %p2506_p12 = scmp.lt.s32.totalorder %s2500_s18, %s2500_s18 }
 0x37a   :  { %p2507_p13 = por %p2506_p12, %p2505_p11 }
 0x37c   :  { %p2508_p0 = pnand %p2507_p13, %p2501_p10 }
 0x37e   :  { %2511 = shalt.err (!%p2508_p0)
}
 0x37f   :  { %s2512_s23 = scalar_lea.hbm %s3070_s2, 6144 }
 0x380   :  { %p2513_p1 = scmp.ne.s32.totalorder %s3070_s2, %s2512_s23  ;;  %p2516_p2 = scmp.lt.u32.totalorder %s2512_s23, %s3070_s2 }
 0x382   :  { %p2518_p3 = pnand %p2516_p2, %p2513_p1 }
 0x384   :  { %2521 = shalt.err (!%p2518_p3)
}
 0x385   :  { %1586 = dma.vmem_to_hbm [thread:$0]  %s1581_s17, 6144, %s3070_s2, [#allocation5], %s2527_s19, %s2527_s19, %s2528_s20  }
 0x386   :  { %2524 = dma.done.wait [#allocation5], 6144  }
 0x387   :  { %2525 = vsyncadd [#allocation5], 4294961152 }
 0x388   :  { %1590 = vsyncpa [#allocation4], 1 }
 0x389   :  { %1591 = vsyncpa [#allocation5], 1 }

</bundles_post_ra>
